<compile_context>
chip_gen: v7x
topology: tpu7x:2x2x1
jax: 0.10.0
libtpu: 0.0.40
codegen_flags: <defaults>
</compile_context>

<pallas_src>
import functools
import math

import jax
import jax.numpy as jnp
from jax.experimental import pallas as pl
from jax.experimental.pallas import tpu as pltpu

RESIZE = 224                      # torch.nn.functional.upsample_bilinear(image, (224, 224))
PATCH = 32                        # ViT-B/32-style patches (synthetic encoder)
GRID = RESIZE // PATCH            # 7
N_PATCHES = GRID * GRID           # 49
PATCH_DIM = 3 * PATCH * PATCH     # 3072
EMBED_DIM = 256                   # synthetic CLIP embedding width


# ----------------------------- JAX glue ------------------------------------
def _upsample_bilinear_align_corners(x, out_h, out_w):
    """NCHW bilinear upsample with align_corners=True (torch upsample_bilinear)."""
    n, c, h, w = x.shape
    ys = jnp.linspace(0.0, h - 1.0, out_h) if h > 1 else jnp.zeros((out_h,), jnp.float32)
    xs = jnp.linspace(0.0, w - 1.0, out_w) if w > 1 else jnp.zeros((out_w,), jnp.float32)
    y0 = jnp.floor(ys).astype(jnp.int32)
    x0 = jnp.floor(xs).astype(jnp.int32)
    y1 = jnp.clip(y0 + 1, 0, h - 1)
    x1 = jnp.clip(x0 + 1, 0, w - 1)
    wy = (ys - y0.astype(jnp.float32)).reshape(1, 1, out_h, 1)
    wx = (xs - x0.astype(jnp.float32)).reshape(1, 1, 1, out_w)
    r0 = x[:, :, y0, :]
    r1 = x[:, :, y1, :]
    top = r0[:, :, :, x0] * (1.0 - wx) + r0[:, :, :, x1] * wx
    bot = r1[:, :, :, x0] * (1.0 - wx) + r1[:, :, :, x1] * wx
    return top * (1.0 - wy) + bot * wy


def _patchify(x):
    """(N, 3, 224, 224) -> (N, 49, 3072)."""
    n, c, h, w = x.shape
    gh, gw = h // PATCH, w // PATCH
    x = x.reshape(n, c, gh, PATCH, gw, PATCH)
    x = x.transpose(0, 2, 4, 1, 3, 5)
    return x.reshape(n, gh * gw, c * PATCH * PATCH)


def _pooled_patches(x):
    """(N, 3, H, W) -> (N, PATCH_DIM): upsample, patchify, mean over the 49 patches.

    mean-pool commutes with the (linear) patch projection, so the kernel only
    needs a (N, 3072) @ (3072, 256) matmul instead of (N*49, 3072) @ ...
    """
    up = _upsample_bilinear_align_corners(x.astype(jnp.float32), RESIZE, RESIZE)
    return jnp.mean(_patchify(up), axis=1)


# ----------------------------- Pallas kernel --------------------------------
def _fused_loss_kernel(scalars_ref, pooled_ref, w_ref, txt_ref, out_ref, *,
                       start_iter, alpha, max_trans, base_trans, trans_factor,
                       trans_loss_lambda, max_depth_var, depth_loss_lambda,
                       exp_zoom, use_depth, has_rgb0, has_trans0, has_dvar0):
    # scalars_ref (SMEM f32[5]): 0 iter, 1 trans_mean, 2 trans_mean0,
    #                            3 depth_var, 4 depth_var0
    # pooled_ref: (2, PATCH_DIM) f32    w_ref: (PATCH_DIM, EMBED_DIM) bf16
    # txt_ref:    (1, EMBED_DIM)  f32 (pre-normalized)   out_ref: (1, 1) f32

    # ---- CLIP branch: pooled-patch projection on the MXU --------------------
    w = w_ref[...].astype(jnp.float32)
    emb = jnp.dot(pooled_ref[...], w, preferred_element_type=jnp.float32)  # (2, E)
    inv_norm = jax.lax.rsqrt(jnp.sum(emb * emb, axis=-1, keepdims=True) + 1e-12)
    feat = emb * inv_norm                                                  # (2, E)
    sim = jnp.sum(feat * txt_ref[...], axis=-1, keepdims=True)             # (2, 1)
    lclip = 1.0 - sim                                # cosine; logit_scale=100 cancels /100
    l_clip = lclip[0:1, :]
    if has_rgb0:
        l_clip = (l_clip + lclip[1:2, :]) * 0.5

    # ---- TransLoss: annealing = 1 - exp(-(iter - 200000 + 1) * alpha) -------
    it = scalars_ref[0]
    ann = 1.0 - jnp.exp(jnp.full((1, 1), -(it - 200000.0 + 1.0) * alpha, jnp.float32))
    recent = (it - start_iter) <= 2000.0

    def _trans(tm_scalar):
        tm = jnp.full((1, 1), tm_scalar, jnp.float32)
        clipped = jnp.where(recent,
                            jnp.minimum(jnp.minimum(tm, base_trans), max_trans),
                            jnp.minimum(tm, max_trans))
        return -ann * trans_factor * clipped

    l_trans = _trans(scalars_ref[1])
    if has_trans0:
        l_trans = l_trans + _trans(scalars_ref[2])

    total = l_clip + trans_loss_lambda * l_trans

    # ---- Depth loss ----------------------------------------------------------
    if use_depth:
        dv = jnp.full((1, 1), scalars_ref[3], jnp.float32)
        l_depth = -jnp.minimum(dv, max_depth_var)
        if has_dvar0:
            dv0 = jnp.full((1, 1), scalars_ref[4], jnp.float32)
            l_depth = l_depth - jnp.minimum(dv0, max_depth_var)
        total = total + depth_loss_lambda * (l_depth * exp_zoom)

    out_ref[...] = total


# ----------------------------- Module wrapper -------------------------------
class ModuleLossesPallas:
    """Pallas re-implementation of ModuleLosses.forward (synthetic CLIP encoder)."""

    def __init__(self, caption, start_iter, hwf, alpha=1e-4, max_trans=0.88,
                 trans_loss_lambda=0.25, use_depth_loss=False, max_depth_var=0.5,
                 depth_loss_lambda=6.0, key=None):
        # TODO(synk): clip.tokenize + pretrained CLIP/BLIP encoders have no Pallas
        # equivalent; caption is replaced by a deterministic synthetic text embedding.
        del caption
        key = jax.random.PRNGKey(0) if key is None else key
        kw, kt = jax.random.split(key)
        w = jax.random.normal(kw, (PATCH_DIM, EMBED_DIM), jnp.float32) * 0.02
        self.w_patch = w.astype(jnp.bfloat16)                 # halves the dominant DMA
        self.w_patch_f32 = self.w_patch.astype(jnp.float32)   # same values, for reference
        txt = jax.random.normal(kt, (1, EMBED_DIM), jnp.float32)
        self.txt_feat = txt / jnp.sqrt(jnp.sum(txt * txt, axis=-1, keepdims=True))
        self.start_iter = float(start_iter)
        self.alpha = float(alpha)
        self.max_trans = float(max_trans)
        self.base_trans = 0.4
        self.trans_factor = 1.0
        self.focal = float(hwf[2])
        self.trans_loss_lambda = float(trans_loss_lambda)
        self.use_depth_loss = bool(use_depth_loss)
        self.max_depth_var = float(max_depth_var)
        self.depth_loss_lambda = float(depth_loss_lambda)
        self.zoom = 0.0

    def __call__(self, rgb_img_in_box, trans_mean, iteration,
                 rgb0_img_in_box=None, trans_mean0=None,
                 depth_var=None, depth_var0=None):
        has_rgb0 = rgb0_img_in_box is not None
        has_trans0 = trans_mean0 is not None
        has_dvar0 = depth_var0 is not None

        # Duplicate rgb when rgb0 is absent (row 1 is statically discarded).
        rgb1 = rgb0_img_in_box if has_rgb0 else rgb_img_in_box
        imgs = jnp.concatenate([rgb_img_in_box, rgb1], axis=0).astype(jnp.float32)
        pooled = _pooled_patches(imgs)                        # (2, PATCH_DIM)

        scalars = jnp.stack([
            jnp.asarray(iteration, jnp.float32),
            jnp.asarray(trans_mean, jnp.float32),
            jnp.asarray(trans_mean0 if has_trans0 else 0.0, jnp.float32),
            jnp.asarray(depth_var if depth_var is not None else 0.0, jnp.float32),
            jnp.asarray(depth_var0 if has_dvar0 else 0.0, jnp.float32),
        ])

        kernel = functools.partial(
            _fused_loss_kernel,
            start_iter=self.start_iter, alpha=self.alpha, max_trans=self.max_trans,
            base_trans=self.base_trans, trans_factor=self.trans_factor,
            trans_loss_lambda=self.trans_loss_lambda,
            max_depth_var=self.max_depth_var,
            depth_loss_lambda=self.depth_loss_lambda,
            exp_zoom=math.exp(self.zoom),
            use_depth=self.use_depth_loss,
            has_rgb0=has_rgb0, has_trans0=has_trans0, has_dvar0=has_dvar0)

        out = pl.pallas_call(
            kernel,
            out_shape=jax.ShapeDtypeStruct((1, 1), jnp.float32),
            grid=(1,),
            in_specs=[pl.BlockSpec(memory_space=pltpu.MemorySpace.SMEM),
                      pl.BlockSpec((2, PATCH_DIM), lambda i: (0, 0)),
                      pl.BlockSpec((PATCH_DIM, EMBED_DIM), lambda i: (0, 0)),
                      pl.BlockSpec((1, EMBED_DIM), lambda i: (0, 0))],
            out_specs=pl.BlockSpec((1, 1), lambda i: (0, 0)),
            compiler_params=pltpu.CompilerParams(
                dimension_semantics=("arbitrary",)),
        )(scalars, pooled, self.w_patch, self.txt_feat)
        return out   # (1, 1), matching torch's (1, num_texts)-shaped clip loss


# ----------------------------- pure-JAX reference ---------------------------
def reference_forward(module, rgb, trans_mean, iteration, rgb0=None, trans_mean0=None,
                      depth_var=None, depth_var0=None):
    def clip_l(img):
        up = _upsample_bilinear_align_corners(img.astype(jnp.float32), RESIZE, RESIZE)
        p = _patchify(up)[0]                                      # (49, 3072)
        feat = jnp.mean(p @ module.w_patch_f32, axis=0)           # mean AFTER matmul
        feat = feat / jnp.sqrt(jnp.sum(feat * feat))
        txt = module.txt_feat[0]
        return 1.0 - jnp.sum(feat * txt)

    l_clip = clip_l(rgb)
    if rgb0 is not None:
        l_clip = (l_clip + clip_l(rgb0)) / 2.0

    annealing = 1.0 - jnp.exp(jnp.float32(-(iteration - 200000 + 1) * module.alpha))

    def trans_l(tm):
        if iteration - module.start_iter <= 2000:
            return -annealing * module.trans_factor * jnp.minimum(
                jnp.minimum(jnp.float32(tm), module.base_trans), module.max_trans)
        return -annealing * module.trans_factor * jnp.minimum(jnp.float32(tm), module.max_trans)

    l_trans = trans_l(trans_mean)
    if trans_mean0 is not None:
        l_trans = l_trans + trans_l(trans_mean0)

    if module.use_depth_loss:
        l_depth = -jnp.minimum(jnp.float32(depth_var), module.max_depth_var)
        if depth_var0 is not None:
            l_depth = l_depth - jnp.minimum(jnp.float32(depth_var0), module.max_depth_var)
        l_depth = l_depth * jnp.exp(jnp.float32(module.zoom))
    else:
        l_depth = 0.0

    return l_clip + module.trans_loss_lambda * l_trans + module.depth_loss_lambda * l_depth


# ----------------------------- main -----------------------------------------
if __name__ == "__main__":
    key = jax.random.PRNGKey(0)
    k_img, k_img0, k_params = jax.random.split(key, 3)

    # Small NCHW RGB crops ("rgb_img_in_box" / "rgb0_img_in_box")
    rgb = jax.random.uniform(k_img, (1, 3, 16, 16), jnp.float32)
    rgb0 = jax.random.uniform(k_img0, (1, 3, 16, 16), jnp.float32)

    start_iter = 200000
    iteration = 201000                      # exercises the iter - start_iter <= 2000 branch
    hwf = (16, 16, 20.0)

    module = ModuleLossesPallas(
        caption="a photo of a chair", start_iter=start_iter, hwf=hwf,
        alpha=1e-4, max_trans=0.88, trans_loss_lambda=0.25,
        use_depth_loss=True, max_depth_var=0.5, depth_loss_lambda=6.0,
        key=k_params)

    trans_mean, trans_mean0 = 0.7, 0.65
    depth_var, depth_var0 = 0.3, 0.6

    out = module(rgb, trans_mean, iteration,
                 rgb0_img_in_box=rgb0, trans_mean0=trans_mean0,
                 depth_var=depth_var, depth_var0=depth_var0)
    out = jax.block_until_ready(out)

    ref = reference_forward(module, rgb, trans_mean, iteration, rgb0=rgb0,
                            trans_mean0=trans_mean0, depth_var=depth_var,
                            depth_var0=depth_var0)

    assert out.shape == (1, 1), out.shape
    assert jnp.allclose(out[0, 0], ref, rtol=1e-3, atol=1e-3), (out, ref)

    # Also exercise the "no rgb0 / no trans0 / no depth_var0" static-flag path.
    out2 = module(rgb, trans_mean, iteration, depth_var=depth_var)
    out2 = jax.block_until_ready(out2)
    ref2 = reference_forward(module, rgb, trans_mean, iteration, depth_var=depth_var)
    assert jnp.allclose(out2[0, 0], ref2, rtol=1e-3, atol=1e-3), (out2, ref2)

    print("KERNEL_OK")
</pallas_src>

<mosaic_0001>
module attributes {stable_mosaic.version = 11 : i64} {
  func.func @_fused_loss_kernel(%arg0: i32, %arg1: memref<5xf32, #tpu.memory_space<smem>>, %arg2: memref<2x3072xf32, #tpu.memory_space<vmem>>, %arg3: memref<3072x256xbf16, #tpu.memory_space<vmem>>, %arg4: memref<1x256xf32, #tpu.memory_space<vmem>>, %arg5: memref<1x1xf32, #tpu.memory_space<vmem>>) attributes {dimension_semantics = [#tpu.dimension_semantics<arbitrary>], iteration_bounds = array<i64: 1>, scalar_prefetch = 0 : i64, scratch_operands = 0 : i64, tpu.core_type = #tpu.core_type<tc>, window_params = [{transform_indices = @transform_0, window_bounds = array<i64: 5>}, {pipeline_mode = #tpu.pipeline_mode<synchronous>, transform_indices = @transform_1, window_bounds = array<i64: 2, 3072>}, {pipeline_mode = #tpu.pipeline_mode<synchronous>, transform_indices = @transform_2, window_bounds = array<i64: 3072, 256>}, {pipeline_mode = #tpu.pipeline_mode<synchronous>, transform_indices = @transform_3, window_bounds = array<i64: 1, 256>}, {pipeline_mode = #tpu.pipeline_mode<synchronous>, transform_indices = @transform_4, window_bounds = array<i64: 1, 1>}]} {
    %c0 = arith.constant 0 : index
    %c0_0 = arith.constant 0 : index
    %0 = vector.load %arg3[%c0, %c0_0] : memref<3072x256xbf16, #tpu.memory_space<vmem>>, vector<3072x256xbf16>
    %1 = arith.extf %0 : vector<3072x256xbf16> to vector<3072x256xf32>
    %c0_1 = arith.constant 0 : index
    %c0_2 = arith.constant 0 : index
    %2 = vector.load %arg2[%c0_1, %c0_2] : memref<2x3072xf32, #tpu.memory_space<vmem>>, vector<2x3072xf32>
    %cst = arith.constant dense<0.000000e+00> : vector<2x256xf32>
    %3 = tpu.matmul %2, %1, %cst {dimension_numbers = #tpu.dot_dimension_numbers<[1], [0], [0], [1], [0, 0, 1, 1], [], []>} : vector<2x3072xf32>, vector<3072x256xf32>, vector<2x256xf32> -> vector<2x256xf32>
    %4 = arith.mulf %3, %3 : vector<2x256xf32>
    %cst_3 = arith.constant dense<0.000000e+00> : vector<2xf32>
    %5 = vector.multi_reduction <add>, %4, %cst_3 [1] : vector<2x256xf32> to vector<2xf32>
    %6 = vector.shape_cast %5 : vector<2xf32> to vector<2x1xf32>
    %cst_4 = arith.constant 9.99999996E-13 : f32
    %7 = vector.broadcast %cst_4 : f32 to vector<2x1xf32>
    %8 = arith.addf %6, %7 : vector<2x1xf32>
    %9 = math.rsqrt %8 : vector<2x1xf32>
    %10 = vector.broadcast %9 : vector<2x1xf32> to vector<2x256xf32>
    %11 = arith.mulf %3, %10 : vector<2x256xf32>
    %c0_5 = arith.constant 0 : index
    %c0_6 = arith.constant 0 : index
    %12 = vector.load %arg4[%c0_5, %c0_6] : memref<1x256xf32, #tpu.memory_space<vmem>>, vector<1x256xf32>
    %13 = vector.broadcast %12 : vector<1x256xf32> to vector<2x256xf32>
    %14 = arith.mulf %11, %13 : vector<2x256xf32>
    %cst_7 = arith.constant dense<0.000000e+00> : vector<2xf32>
    %15 = vector.multi_reduction <add>, %14, %cst_7 [1] : vector<2x256xf32> to vector<2xf32>
    %16 = vector.shape_cast %15 : vector<2xf32> to vector<2x1xf32>
    %cst_8 = arith.constant 1.000000e+00 : f32
    %17 = vector.broadcast %cst_8 : f32 to vector<2x1xf32>
    %18 = arith.subf %17, %16 : vector<2x1xf32>
    %19 = vector.extract_strided_slice %18 {offsets = [0, 0], sizes = [1, 1], strides = [1, 1]} : vector<2x1xf32> to vector<1x1xf32>
    %20 = vector.extract_strided_slice %18 {offsets = [1, 0], sizes = [1, 1], strides = [1, 1]} : vector<2x1xf32> to vector<1x1xf32>
    %21 = arith.addf %19, %20 : vector<1x1xf32>
    %cst_9 = arith.constant 5.000000e-01 : f32
    %22 = vector.broadcast %cst_9 : f32 to vector<1x1xf32>
    %23 = arith.mulf %21, %22 : vector<1x1xf32>
    %c0_10 = arith.constant 0 : index
    %24 = memref.load %arg1[%c0_10] : memref<5xf32, #tpu.memory_space<smem>>
    %cst_11 = arith.constant 2.000000e+05 : f32
    %25 = arith.subf %24, %cst_11 : f32
    %cst_12 = arith.constant 1.000000e+00 : f32
    %26 = arith.addf %25, %cst_12 : f32
    %cst_13 = arith.constant 0.000000e+00 : f32
    %27 = arith.subf %cst_13, %26 : f32
    %cst_14 = arith.constant 9.99999974E-5 : f32
    %28 = arith.mulf %27, %cst_14 : f32
    %29 = vector.broadcast %28 : f32 to vector<1x1xf32>
    %30 = math.exp %29 : vector<1x1xf32>
    %cst_15 = arith.constant 1.000000e+00 : f32
    %31 = vector.broadcast %cst_15 : f32 to vector<1x1xf32>
    %32 = arith.subf %31, %30 : vector<1x1xf32>
    %cst_16 = arith.constant 2.000000e+05 : f32
    %33 = arith.subf %24, %cst_16 : f32
    %cst_17 = arith.constant 2.000000e+03 : f32
    %34 = arith.cmpf ole, %33, %cst_17 : f32
    %c1 = arith.constant 1 : index
    %35 = memref.load %arg1[%c1] : memref<5xf32, #tpu.memory_space<smem>>
    %36 = vector.broadcast %35 : f32 to vector<1x1xf32>
    %cst_18 = arith.constant 4.000000e-01 : f32
    %37 = vector.broadcast %cst_18 : f32 to vector<1x1xf32>
    %38 = arith.minimumf %36, %37 : vector<1x1xf32>
    %cst_19 = arith.constant 0.879999995 : f32
    %39 = vector.broadcast %cst_19 : f32 to vector<1x1xf32>
    %40 = arith.minimumf %38, %39 : vector<1x1xf32>
    %cst_20 = arith.constant 0.879999995 : f32
    %41 = vector.broadcast %cst_20 : f32 to vector<1x1xf32>
    %42 = arith.minimumf %36, %41 : vector<1x1xf32>
    %43 = arith.select %34, %40, %42 : vector<1x1xf32>
    %cst_21 = arith.constant 0.000000e+00 : f32
    %44 = vector.broadcast %cst_21 : f32 to vector<1x1xf32>
    %45 = arith.subf %44, %32 : vector<1x1xf32>
    %cst_22 = arith.constant 1.000000e+00 : f32
    %46 = vector.broadcast %cst_22 : f32 to vector<1x1xf32>
    %47 = arith.mulf %45, %46 : vector<1x1xf32>
    %48 = arith.mulf %47, %43 : vector<1x1xf32>
    %c2 = arith.constant 2 : index
    %49 = memref.load %arg1[%c2] : memref<5xf32, #tpu.memory_space<smem>>
    %50 = vector.broadcast %49 : f32 to vector<1x1xf32>
    %cst_23 = arith.constant 4.000000e-01 : f32
    %51 = vector.broadcast %cst_23 : f32 to vector<1x1xf32>
    %52 = arith.minimumf %50, %51 : vector<1x1xf32>
    %cst_24 = arith.constant 0.879999995 : f32
    %53 = vector.broadcast %cst_24 : f32 to vector<1x1xf32>
    %54 = arith.minimumf %52, %53 : vector<1x1xf32>
    %cst_25 = arith.constant 0.879999995 : f32
    %55 = vector.broadcast %cst_25 : f32 to vector<1x1xf32>
    %56 = arith.minimumf %50, %55 : vector<1x1xf32>
    %57 = arith.select %34, %54, %56 : vector<1x1xf32>
    %cst_26 = arith.constant 0.000000e+00 : f32
    %58 = vector.broadcast %cst_26 : f32 to vector<1x1xf32>
    %59 = arith.subf %58, %32 : vector<1x1xf32>
    %cst_27 = arith.constant 1.000000e+00 : f32
    %60 = vector.broadcast %cst_27 : f32 to vector<1x1xf32>
    %61 = arith.mulf %59, %60 : vector<1x1xf32>
    %62 = arith.mulf %61, %57 : vector<1x1xf32>
    %63 = arith.addf %48, %62 : vector<1x1xf32>
    %cst_28 = arith.constant 2.500000e-01 : f32
    %64 = vector.broadcast %cst_28 : f32 to vector<1x1xf32>
    %65 = arith.mulf %64, %63 : vector<1x1xf32>
    %66 = arith.addf %23, %65 : vector<1x1xf32>
    %c3 = arith.constant 3 : index
    %67 = memref.load %arg1[%c3] : memref<5xf32, #tpu.memory_space<smem>>
    %68 = vector.broadcast %67 : f32 to vector<1x1xf32>
    %cst_29 = arith.constant 5.000000e-01 : f32
    %69 = vector.broadcast %cst_29 : f32 to vector<1x1xf32>
    %70 = arith.minimumf %68, %69 : vector<1x1xf32>
    %cst_30 = arith.constant 0.000000e+00 : f32
    %71 = vector.broadcast %cst_30 : f32 to vector<1x1xf32>
    %72 = arith.subf %71, %70 : vector<1x1xf32>
    %c4 = arith.constant 4 : index
    %73 = memref.load %arg1[%c4] : memref<5xf32, #tpu.memory_space<smem>>
    %74 = vector.broadcast %73 : f32 to vector<1x1xf32>
    %cst_31 = arith.constant 5.000000e-01 : f32
    %75 = vector.broadcast %cst_31 : f32 to vector<1x1xf32>
    %76 = arith.minimumf %74, %75 : vector<1x1xf32>
    %77 = arith.subf %72, %76 : vector<1x1xf32>
    %cst_32 = arith.constant 1.000000e+00 : f32
    %78 = vector.broadcast %cst_32 : f32 to vector<1x1xf32>
    %79 = arith.mulf %77, %78 : vector<1x1xf32>
    %cst_33 = arith.constant 6.000000e+00 : f32
    %80 = vector.broadcast %cst_33 : f32 to vector<1x1xf32>
    %81 = arith.mulf %80, %79 : vector<1x1xf32>
    %82 = arith.addf %66, %81 : vector<1x1xf32>
    %c0_34 = arith.constant 0 : index
    %c0_35 = arith.constant 0 : index
    %83 = vector.load %arg5[%c0_34, %c0_35] : memref<1x1xf32, #tpu.memory_space<vmem>>, vector<1x1xf32>
    tpu.vector_store %arg5[%c0_34, %c0_35], %82 {strides = array<i32>} : memref<1x1xf32, #tpu.memory_space<vmem>>, vector<1x1xf32>,
    return
  }
  func.func @transform_0(%arg0: i32) -> i32 {
    %c0_i32 = arith.constant 0 : i32
    %c0_i32_0 = arith.constant 0 : i32
    return %c0_i32 : i32
  }
  func.func @transform_1(%arg0: i32) -> (i32, i32) {
    %c0_i32 = arith.constant 0 : i32
    %c0_i32_0 = arith.constant 0 : i32
    %c0_i32_1 = arith.constant 0 : i32
    return %c0_i32, %c0_i32_0 : i32, i32
  }
  func.func @transform_2(%arg0: i32) -> (i32, i32) {
    %c0_i32 = arith.constant 0 : i32
    %c0_i32_0 = arith.constant 0 : i32
    %c0_i32_1 = arith.constant 0 : i32
    return %c0_i32, %c0_i32_0 : i32, i32
  }
  func.func @transform_3(%arg0: i32) -> (i32, i32) {
    %c0_i32 = arith.constant 0 : i32
    %c0_i32_0 = arith.constant 0 : i32
    %c0_i32_1 = arith.constant 0 : i32
    return %c0_i32, %c0_i32_0 : i32, i32
  }
  func.func @transform_4(%arg0: i32) -> (i32, i32) {
    %c0_i32 = arith.constant 0 : i32
    %c0_i32_0 = arith.constant 0 : i32
    %c0_i32_1 = arith.constant 0 : i32
    return %c0_i32, %c0_i32_0 : i32, i32
  }
}

</mosaic_0001>

<bundles_post_ra>
// kernel: tpu_custom_call.1
= control target key start
LH: loop header
LB: loop body
LE: loop exit
PB: predicated region body
PF: predicated region fallthrough
CT: control target
= control target key end

     0   :  { %9 = vsyncpa [#allocation5], 0  ;;  %s4370_s0 = inlined_call_operand.hbm [shape: f32[5], index: 0, kind: input, shape index: {}]   ;;  %s4371_s1 = inlined_call_operand.hbm [shape: f32[2,3072], index: 1, kind: input, shape index: {}]   ;;  %s4372_s2 = inlined_call_operand.hbm [shape: bf16[3072,256], index: 2, kind: input, shape index: {}]   ;;  %s4373_s3 = inlined_call_operand.hbm [shape: f32[1,256], index: 3, kind: input, shape index: {}]   ;;  %s4374_s4 = inlined_call_operand.hbm [shape: f32[1,1], index: 4, kind: output, shape index: {}]  }
   0x1   :  { %10 = vsyncpa [#allocation3], 0 }
   0x2   :  { %11 = vsyncpa [#allocation8], 0 }
   0x3   :  { %12 = vsyncpa [#allocation4], 0  ;;  %s4184_s15 = smov [#allocation7]   ;;  %s4078_s19 = scalar_lea.hbm %s4372_s2, 49152 }
   0x4   :  { %s36_s16 = sshll.u32 %s4184_s15, 4  ;;  %p4079_p0 = scmp.ne.s32.totalorder %s4372_s2, %s4078_s19  ;;  %s37_s16 = int_to_ptr.vmem [resolvable:$true] %s36_s16 }
   0x5   :  { %p4082_p1 = scmp.lt.u32.totalorder %s4078_s19, %s4372_s2 }
   0x7   :  { %p4084_p2 = pnand %p4082_p1, %p4079_p0 }
   0x9   :  { %4087 = shalt.err (!%p4084_p2)
}
   0xa   :  { %s4088_s24 = scalar_lea.vmem %s37_s16, 49152  ;;  %p4093_p4 = scmp.lt.s32.totalorder %s37_s16, %s37_s16 }
   0xb   :  { %p4089_p3 = scmp.ne.s32.totalorder %s37_s16, %s4088_s24  ;;  %p4094_p5 = scmp.lt.s32.totalorder %s4088_s24, %s4088_s24 }
   0xd   :  { %p4095_p6 = por %p4094_p5, %p4093_p4 }
   0xf   :  { %p4096_p7 = pnand %p4095_p6, %p4089_p3 }
  0x11   :  { %4099 = shalt.err (!%p4096_p7)
}
  0x12   :  { %s4185_s25 = smov 128   ;;  %s4186_s26 = smov 8  }
  0x13   :  { %42 = dma.hbm_to_vmem [thread:$0]  %s4372_s2, 49152, %s37_s16, [#allocation8], %s4185_s25, %s4185_s25, %s4186_s26  }
  0x14   :  { %s4100_s5 = scalar_lea.hbm %s4370_s0, 16 }
  0x15   :  { %p4101_p8 = scmp.ne.s32.totalorder %s4370_s0, %s4100_s5  ;;  %p4104_p9 = scmp.lt.u32.totalorder %s4100_s5, %s4370_s0 }
  0x17   :  { %p4106_p10 = pnand %p4104_p9, %p4101_p8 }
  0x19   :  { %4109 = shalt.err (!%p4106_p10)
}
  0x1a   :  { %s4187_s10 = smov [#allocation2]   ;;  %s4188_s2 = smov [#allocation6]  }
  0x1b   :  { %20 = dma.hbm_to_smem %s4370_s0, 16, %s4187_s10, [#allocation5]  }
  0x1c   :  { %s27_s13 = sshll.u32 %s4188_s2, 4  ;;  %s4189_s14 = smov [#allocation9]   ;;  %s28_s13 = int_to_ptr.vmem [resolvable:$true] %s27_s13 }
  0x1d   :  { %s49_s15 = sshll.u32 %s4189_s14, 4  ;;  %s4110_s18 = scalar_lea.hbm %s4371_s1, 768  ;;  %s50_s15 = int_to_ptr.vmem [resolvable:$true] %s49_s15 }
  0x1e   :  { %p4111_p11 = scmp.ne.s32.totalorder %s4371_s1, %s4110_s18  ;;  %p4114_p12 = scmp.lt.u32.totalorder %s4110_s18, %s4371_s1 }
  0x20   :  { %p4116_p13 = pnand %p4114_p12, %p4111_p11 }
  0x22   :  { %4119 = shalt.err (!%p4116_p13)
}
  0x23   :  { %s4120_s0 = scalar_lea.vmem %s28_s13, 768  ;;  %p4125_p1 = scmp.lt.s32.totalorder %s28_s13, %s28_s13 }
  0x24   :  { %p4121_p0 = scmp.ne.s32.totalorder %s28_s13, %s4120_s0  ;;  %p4126_p2 = scmp.lt.s32.totalorder %s4120_s0, %s4120_s0 }
  0x26   :  { %p4127_p3 = por %p4126_p2, %p4125_p1 }
  0x28   :  { %p4128_p4 = pnand %p4127_p3, %p4121_p0 }
  0x2a   :  { %4131 = shalt.err (!%p4128_p4)
}
  0x2b   :  { %30 = dma.hbm_to_vmem [thread:$0]  %s4371_s1, 768, %s28_s13, [#allocation3]  }
  0x2c   :  { %s4132_s27 = scalar_lea.hbm %s4373_s3, 32 }
  0x2d   :  { %p4133_p5 = scmp.ne.s32.totalorder %s4373_s3, %s4132_s27  ;;  %p4136_p6 = scmp.lt.u32.totalorder %s4132_s27, %s4373_s3 }
  0x2f   :  { %p4138_p7 = pnand %p4136_p6, %p4133_p5 }
  0x31   :  { %4141 = shalt.err (!%p4138_p7)
}
  0x32   :  { %s4142_s6 = scalar_lea.vmem %s50_s15, 32  ;;  %p4147_p9 = scmp.lt.s32.totalorder %s50_s15, %s50_s15 }
  0x33   :  { %p4143_p8 = scmp.ne.s32.totalorder %s50_s15, %s4142_s6  ;;  %p4148_p10 = scmp.lt.s32.totalorder %s4142_s6, %s4142_s6 }
  0x35   :  { %p4149_p11 = por %p4148_p10, %p4147_p9 }
  0x37   :  { %p4150_p12 = pnand %p4149_p11, %p4143_p8 }
  0x39   :  { %4153 = shalt.err (!%p4150_p12)
}
  0x3a   :  { %52 = dma.hbm_to_vmem [thread:$0]  %s4373_s3, 32, %s50_s15, [#allocation8]  }
  0x3b   :  { %4176 = dma.done.wait [#allocation5], 16  }
  0x3c   :  { %4177 = vsyncadd [#allocation5], 4294967280 }
  0x3d   :  { %4178 = dma.done.wait [#allocation3], 768  }
  0x3e   :  { %4179 = vsyncadd [#allocation3], 4294966528 }
  0x3f   :  { %4180 = dma.done.wait [#allocation8], 49184  }
  0x40   :  { %4181 = vsyncadd [#allocation8], 4294918112 }
  0x41   :  { %65 = sfence }
  0x42   :  { %v3492_v0 = vld [vmem:[#allocation7 + $0x4] ss:$8 sps:$4 sm:$0xff]   ;;  %v3496_v2 = vld [vmem:[#allocation7] ss:$8 sps:$4 sm:$0xff]   ;;  %v3498_v4 = vld [vmem:[#allocation7 + $0x14] ss:$8 sps:$4 sm:$0xff]   ;;  %v1234_v38 = vlaneseq }
  0x43   :  { %v3494_v1 = vld [vmem:[#allocation7 + $0x604] ss:$8 sps:$4 sm:$0xff]   ;;  %2311 = vmatprep.subr.bf16.mxu1 %v3492_v0  ;;  %v3497_v3 = vld [vmem:[#allocation7 + $0x600] ss:$8 sps:$4 sm:$0xff]   ;;  %v3500_v5 = vld [vmem:[#allocation7 + $0x614] ss:$8 sps:$4 sm:$0xff]  }
  0x44   :  { %2695 = vmatprep.subr.bf16.mxu0 %v3494_v1  ;;  %2313 = vmatpush1.bf16.msra.mxu1 %v3496_v2  ;;  %v3502_v6 = vld [vmem:[#allocation7 + $0x10] ss:$8 sps:$4 sm:$0xff]   ;;  %v3504_v8 = vld [vmem:[#allocation7 + $0x24] ss:$8 sps:$4 sm:$0xff]   ;;  %v3508_v10 = vld [vmem:[#allocation7 + $0x20] ss:$8 sps:$4 sm:$0xff]  }
  0x45   :  { %2697 = vmatpush1.bf16.msra.mxu0 %v3497_v3  ;;  %2315 = vmatprep.subr.bf16.mxu1 %v3498_v4  ;;  %v3503_v7 = vld [vmem:[#allocation7 + $0x610] ss:$8 sps:$4 sm:$0xff]   ;;  %v3506_v9 = vld [vmem:[#allocation7 + $0x624] ss:$8 sps:$4 sm:$0xff]   ;;  %v3509_v11 = vld [vmem:[#allocation7 + $0x620] ss:$8 sps:$4 sm:$0xff]  }
  0x46   :  { %2699 = vmatprep.subr.bf16.mxu0 %v3500_v5  ;;  %v3510_v12 = vld [vmem:[#allocation7 + $0x34] ss:$8 sps:$4 sm:$0xff]   ;;  %v3514_v14 = vld [vmem:[#allocation7 + $0x30] ss:$8 sps:$4 sm:$0xff]   ;;  %v3516_v16 = vld [vmem:[#allocation7 + $0x44] ss:$8 sps:$4 sm:$0xff]  }
  0x47   :  { %v3512_v13 = vld [vmem:[#allocation7 + $0x634] ss:$8 sps:$4 sm:$0xff]   ;;  %v3515_v15 = vld [vmem:[#allocation7 + $0x630] ss:$8 sps:$4 sm:$0xff]   ;;  %v3518_v17 = vld [vmem:[#allocation7 + $0x644] ss:$8 sps:$4 sm:$0xff]  }
  0x48   :  { %2317 = vmatpush1.bf16.msra.mxu1 %v3502_v6  ;;  %v3520_v18 = vld [vmem:[#allocation7 + $0x40] ss:$8 sps:$4 sm:$0xff]   ;;  %v3522_v20 = vld [vmem:[#allocation7 + $0x54] ss:$8 sps:$4 sm:$0xff]   ;;  %v3526_v22 = vld [vmem:[#allocation7 + $0x50] ss:$8 sps:$4 sm:$0xff]  }
  0x49   :  { %2701 = vmatpush1.bf16.msra.mxu0 %v3503_v7  ;;  %2319 = vmatprep.subr.bf16.mxu1 %v3504_v8  ;;  %v3521_v19 = vld [vmem:[#allocation7 + $0x640] ss:$8 sps:$4 sm:$0xff]   ;;  %v3524_v21 = vld [vmem:[#allocation7 + $0x654] ss:$8 sps:$4 sm:$0xff]   ;;  %v3527_v23 = vld [vmem:[#allocation7 + $0x650] ss:$8 sps:$4 sm:$0xff]  }
  0x4a   :  { %2703 = vmatprep.subr.bf16.mxu0 %v3506_v9  ;;  %v3528_v24 = vld [vmem:[#allocation7 + $0x64] ss:$8 sps:$4 sm:$0xff]   ;;  %v3532_v26 = vld [vmem:[#allocation7 + $0x60] ss:$8 sps:$4 sm:$0xff]   ;;  %v3534_v28 = vld [vmem:[#allocation7 + $0x74] ss:$8 sps:$4 sm:$0xff]  }
  0x4b   :  { %v3530_v25 = vld [vmem:[#allocation7 + $0x664] ss:$8 sps:$4 sm:$0xff]   ;;  %v3533_v27 = vld [vmem:[#allocation7 + $0x660] ss:$8 sps:$4 sm:$0xff]   ;;  %v3536_v29 = vld [vmem:[#allocation7 + $0x674] ss:$8 sps:$4 sm:$0xff]  }
  0x4c   :  { %2321 = vmatpush1.bf16.msra.mxu1 %v3508_v10  ;;  %v3538_v30 = vld [vmem:[#allocation7 + $0x70] ss:$8 sps:$4 sm:$0xff]   ;;  %v3540_v32 = vld [vmem:[#allocation7 + $0x84] ss:$8 sps:$4 sm:$0xff]   ;;  %v3544_v34 = vld [vmem:[#allocation7 + $0x80] ss:$8 sps:$4 sm:$0xff]  }
  0x4d   :  { %2705 = vmatpush1.bf16.msra.mxu0 %v3509_v11  ;;  %2323 = vmatprep.subr.bf16.mxu1 %v3510_v12  ;;  %v3539_v31 = vld [vmem:[#allocation7 + $0x670] ss:$8 sps:$4 sm:$0xff]   ;;  %v3542_v33 = vld [vmem:[#allocation7 + $0x684] ss:$8 sps:$4 sm:$0xff]   ;;  %v3545_v35 = vld [vmem:[#allocation7 + $0x680] ss:$8 sps:$4 sm:$0xff]  }
  0x4e   :  { %2707 = vmatprep.subr.bf16.mxu0 %v3512_v13  ;;  %v4190_v36 = vmov 1983009808   ;;  %v3546_v39 = vld [vmem:[#allocation7 + $0x94] ss:$8 sps:$4 sm:$0xff]   ;;  %v3550_v41 = vld [vmem:[#allocation7 + $0x90] ss:$8 sps:$4 sm:$0xff]  }
  0x4f   :  { %v1232_v37 = vunpack.c.l.s4 %v4190_v36  ;;  %v3548_v40 = vld [vmem:[#allocation7 + $0x694] ss:$8 sps:$4 sm:$0xff]   ;;  %v4265_v43 = vshrl.u32 %v1234_v38, 7  ;;  %v3551_v44 = vld [vmem:[#allocation7 + $0x690] ss:$8 sps:$4 sm:$0xff]   ;;  %v1221_v56 = vld [vmem:[#allocation6 + $0x18] sm:$0xff] }
  0x50   :  { %2325 = vmatpush1.bf16.msra.mxu1 %v3514_v14  ;;  %v3552_v45 = vld [vmem:[#allocation7 + $0xa4] ss:$8 sps:$4 sm:$0xff]   ;;  %v3556_v47 = vld [vmem:[#allocation7 + $0xa0] ss:$8 sps:$4 sm:$0xff]   ;;  %v3558_v50 = vld [vmem:[#allocation7 + $0xb4] ss:$8 sps:$4 sm:$0xff]   ;;  %v1281_v11 = vcombine.high %v1221_v56, %v1221_v56 }
  0x51   :  { %2709 = vmatpush1.bf16.msra.mxu0 %v3515_v15  ;;  %2327 = vmatprep.subr.bf16.mxu1 %v3516_v16  ;;  %v1233_v42 = vunpack.c.0.s8 %v1232_v37  ;;  %v3554_v46 = vld [vmem:[#allocation7 + $0x6a4] ss:$8 sps:$4 sm:$0xff]   ;;  %v3557_v48 = vld [vmem:[#allocation7 + $0x6a0] ss:$8 sps:$4 sm:$0xff]   ;;  %v3560_v51 = vld [vmem:[#allocation7 + $0x6b4] ss:$8 sps:$4 sm:$0xff]  }
  0x52   :  { %2711 = vmatprep.subr.bf16.mxu0 %v3518_v17  ;;  %v1218_v52 = vld [vmem:[#allocation6] sm:$0xff]  ;;  %v3564_v57 = vld [vmem:[#allocation7 + $0xc4] ss:$8 sps:$4 sm:$0xff]   ;;  %v3568_v62 = vld [vmem:[#allocation7 + $0xc0] ss:$8 sps:$4 sm:$0xff]   ;;  %vm2210_vm0 = vcmask 1041408  }
  0x53   :  { %v4268_v49 = vsub.s32 %v1233_v42, %v4265_v43  ;;  %v3562_v53 = vld [vmem:[#allocation7 + $0xb0] ss:$8 sps:$4 sm:$0xff]   ;;  %v3566_v58 = vld [vmem:[#allocation7 + $0x6c4] ss:$8 sps:$4 sm:$0xff]   ;;  %v3569_v63 = vld [vmem:[#allocation7 + $0x6c0] ss:$8 sps:$4 sm:$0xff]   ;;  %v1230_v10 = vcombine.high %v1218_v52, %v1218_v52 }
  0x54   :  { %2329 = vmatpush1.bf16.msra.mxu1 %v3520_v18  ;;  %v3563_v55 = vld [vmem:[#allocation7 + $0x6b0] ss:$8 sps:$4 sm:$0xff]   ;;  %v3570_v0 = vld [vmem:[#allocation7 + $0xd4] ss:$8 sps:$4 sm:$0xff]   ;;  %v3576_v4 = vld [vmem:[#allocation7 + $0xe4] ss:$8 sps:$4 sm:$0xff]  }
  0x55   :  { %2713 = vmatpush1.bf16.msra.mxu0 %v3521_v19  ;;  %2331 = vmatprep.subr.bf16.mxu1 %v3522_v20  ;;  %v1237_v54 = vrot.slane %v1218_v52, %v4268_v49  ;;  %v1288_v60 = vrot.slane %v1221_v56, %v4268_v49  ;;  %v3572_v1 = vld [vmem:[#allocation7 + $0x6d4] ss:$8 sps:$4 sm:$0xff]   ;;  %v3574_v2 = vld [vmem:[#allocation7 + $0xd0] ss:$8 sps:$4 sm:$0xff]   ;;  %v3578_v5 = vld [vmem:[#allocation7 + $0x6e4] ss:$8 sps:$4 sm:$0xff]   ;;  %v4273_v16 = vrot.slane %v1230_v10, %v4268_v49 }
  0x56   :  { %2715 = vmatprep.subr.bf16.mxu0 %v3524_v21  ;;  %v3575_v3 = vld [vmem:[#allocation7 + $0x6d0] ss:$8 sps:$4 sm:$0xff]   ;;  %v3580_v6 = vld [vmem:[#allocation7 + $0xe0] ss:$8 sps:$4 sm:$0xff]   ;;  %v3582_v8 = vld [vmem:[#allocation7 + $0xf4] ss:$8 sps:$4 sm:$0xff]   ;;  %v4276_v17 = vrot.slane %v1281_v11, %v4268_v49 }
  0x57   :  { %v1245_v59 = vcombine.high %v1237_v54, %v1237_v54  ;;  %v1296_v61 = vcombine.high %v1288_v60, %v1288_v60  ;;  %v3581_v7 = vld [vmem:[#allocation7 + $0x6e0] ss:$8 sps:$4 sm:$0xff]   ;;  %v3584_v9 = vld [vmem:[#allocation7 + $0x6f4] ss:$8 sps:$4 sm:$0xff]   ;;  %v3586_v12 = vld [vmem:[#allocation7 + $0xf0] ss:$8 sps:$4 sm:$0xff]  }
  0x58   :  { %2333 = vmatpush1.bf16.msra.mxu1 %v3526_v22  ;;  %v3587_v13 = vld [vmem:[#allocation7 + $0x6f0] ss:$8 sps:$4 sm:$0xff]   ;;  %v3589_v14 = vld [vmem:[#allocation7 + $0x104] ss:$8 sps:$4 sm:$0xff]   ;;  %v3591_v18 = vld [vmem:[#allocation7 + $0x100] ss:$8 sps:$4 sm:$0xff]   ;;  %v1246_v22 = vcombine.high %v4273_v16, %v4273_v16 }
  0x59   :  { %2717 = vmatpush1.bf16.msra.mxu0 %v3527_v23  ;;  %2335 = vmatprep.subr.bf16.mxu1 %v3528_v24  ;;  %v3593_v15 = vld [vmem:[#allocation7 + $0x704] ss:$8 sps:$4 sm:$0xff]   ;;  %v3595_v19 = vld [vmem:[#allocation7 + $0x700] ss:$8 sps:$4 sm:$0xff]   ;;  %v3596_v20 = vld [vmem:[#allocation7 + $0x114] ss:$8 sps:$4 sm:$0xff]   ;;  %v1297_v23 = vcombine.high %v4276_v17, %v4276_v17 }
  0x5a   :  { %2719 = vmatprep.subr.bf16.mxu0 %v3530_v25  ;;  %1420 = vmatprep.mubr.f32.mxu1 %v1245_v59  ;;  %v3599_v21 = vld [vmem:[#allocation7 + $0x714] ss:$8 sps:$4 sm:$0xff]   ;;  %v3598_v24 = vld [vmem:[#allocation7 + $0x110] ss:$8 sps:$4 sm:$0xff]   ;;  %v3616_v36 = vld [vmem:[#allocation7 + $0x140] ss:$8 sps:$4 sm:$0xff]  }
  0x5b   :  { %1846 = vmatprep.mubr.f32.mxu0 %v1296_v61  ;;  %v3601_v25 = vld [vmem:[#allocation7 + $0x710] ss:$8 sps:$4 sm:$0xff]   ;;  %v3619_v37 = vld [vmem:[#allocation7 + $0x740] ss:$8 sps:$4 sm:$0xff]   ;;  %v3620_v38 = vld [vmem:[#allocation7 + $0x154] ss:$8 sps:$4 sm:$0xff]  }
  0x5c   :  { %2337 = vmatpush1.bf16.msra.mxu1 %v3532_v26  ;;  %v3602_v26 = vld [vmem:[#allocation7 + $0x124] ss:$8 sps:$4 sm:$0xff]   ;;  %v3644_v56 = vld [vmem:[#allocation7 + $0x194] ss:$8 sps:$4 sm:$0xff]   ;;  %v3649_v59 = vld [vmem:[#allocation7 + $0x790] ss:$8 sps:$4 sm:$0xff]  }
  0x5d   :  { %2721 = vmatpush1.bf16.msra.mxu0 %v3533_v27  ;;  %2339 = vmatprep.subr.bf16.mxu1 %v3534_v28  ;;  %v3605_v27 = vld [vmem:[#allocation7 + $0x724] ss:$8 sps:$4 sm:$0xff]   ;;  %v3604_v28 = vld [vmem:[#allocation7 + $0x120] ss:$8 sps:$4 sm:$0xff]   ;;  %v3670_v10 = vld [vmem:[#allocation7 + $0x1d0] ss:$8 sps:$4 sm:$0xff]  }
  0x5e   :  { %2723 = vmatprep.subr.bf16.mxu0 %v3536_v29  ;;  %v3607_v29 = vld [vmem:[#allocation7 + $0x720] ss:$8 sps:$4 sm:$0xff]   ;;  %v3626_v42 = vld [vmem:[#allocation7 + $0x164] ss:$8 sps:$4 sm:$0xff]   ;;  %v3673_v11 = vld [vmem:[#allocation7 + $0x7d0] ss:$8 sps:$4 sm:$0xff]  }
  0x5f   :  { %v3638_v52 = vld [vmem:[#allocation7 + $0x184] ss:$8 sps:$4 sm:$0xff]   ;;  %s2245_s3 = sld [smem:[#allocation2]]  ;;  %s2306_s12 = sld [smem:[#allocation2 + $0x1]]  ;;  %vm2286_vm2 = vcmask 0  }
  0x60   :  { %2341 = vmatpush1.bf16.msra.mxu1 %v3538_v30  ;;  %v3608_v30 = vld [vmem:[#allocation7 + $0x134] ss:$8 sps:$4 sm:$0xff]   ;;  %v3653_v61 = vld [vmem:[#allocation7 + $0x7a4] ss:$8 sps:$4 sm:$0xff]   ;;  %s2307_s2 = sld [smem:[#allocation2 + $0x2]]  ;;  %s2308_s14 = sld [smem:[#allocation2 + $0x3]] }
  0x61   :  { %2725 = vmatpush1.bf16.msra.mxu0 %v3539_v31  ;;  %2343 = vmatprep.subr.bf16.mxu1 %v3540_v32  ;;  %v3611_v31 = vld [vmem:[#allocation7 + $0x734] ss:$8 sps:$4 sm:$0xff]   ;;  %v3610_v32 = vld [vmem:[#allocation7 + $0x130] ss:$8 sps:$4 sm:$0xff]   ;;  %s2309_s15 = sld [smem:[#allocation2 + $0x4]]  ;;  %s4191_s16 = smov [#allocation10]  }
  0x62   :  { %2727 = vmatprep.subr.bf16.mxu0 %v3542_v33  ;;  %v3613_v33 = vld [vmem:[#allocation7 + $0x730] ss:$8 sps:$4 sm:$0xff]   ;;  %s2294_s17 = sshll.u32 %s4191_s16, 4  ;;  %s2295_s17 = int_to_ptr.vmem [resolvable:$true] %s2294_s17 }
  0x63   :  { %s4154_s18 = scalar_lea.vmem %s2295_s17, 16  ;;  %s4158_s19 = scalar_lea.vmem %s2295_s17, 32 }
  0x64   :  { %2345 = vmatpush1.bf16.msra.mxu1 %v3544_v34  ;;  %v3614_v34 = vld [vmem:[#allocation7 + $0x144] ss:$8 sps:$4 sm:$0xff]   ;;  %p4155_p0 = scmp.ne.s32.totalorder %s2295_s17, %s4154_s18  ;;  %p4159_p1 = scmp.lt.s32.totalorder %s2295_s17, %s2295_s17 }
  0x65   :  { %2729 = vmatpush1.bf16.msra.mxu0 %v3545_v35  ;;  %2347 = vmatprep.subr.bf16.mxu1 %v3546_v39  ;;  %v3617_v35 = vld [vmem:[#allocation7 + $0x744] ss:$8 sps:$4 sm:$0xff]   ;;  %v3623_v39 = vld [vmem:[#allocation7 + $0x754] ss:$8 sps:$4 sm:$0xff]   ;;  %s2305_s8 = sadd.f32 -200000.0, %s2245_s3  ;;  %p4160_p2 = scmp.lt.s32.totalorder %s4158_s19, %s4154_s18 }
  0x66   :  { %2731 = vmatprep.subr.bf16.mxu0 %v3548_v40  ;;  %v3622_v40 = vld [vmem:[#allocation7 + $0x150] ss:$8 sps:$4 sm:$0xff]  }
  0x67   :  { %s2247_s9 = sadd.f32 1.0, %s2305_s8  ;;  %p2254_p13 = scmp.le.f32.partialorder %s2305_s8, 2000.0 }
  0x68   :  { %2349 = vmatpush1.bf16.msra.mxu1 %v3550_v41  ;;  %v3625_v41 = vld [vmem:[#allocation7 + $0x750] ss:$8 sps:$4 sm:$0xff]   ;;  %p4161_p3 = por %p4160_p2, %p4159_p1 }
  0x69   :  { %2733 = vmatpush1.bf16.msra.mxu0 %v3551_v44  ;;  %2351 = vmatprep.subr.bf16.mxu1 %v3552_v45  ;;  %v3629_v44 = vld [vmem:[#allocation7 + $0x764] ss:$8 sps:$4 sm:$0xff]   ;;  %v3628_v45 = vld [vmem:[#allocation7 + $0x160] ss:$8 sps:$4 sm:$0xff]   ;;  %s2248_s10 = ssub.f32 0.0, %s2247_s9 }
  0x6a   :  { %2735 = vmatprep.subr.bf16.mxu0 %v3554_v46  ;;  %v3631_v46 = vld [vmem:[#allocation7 + $0x760] ss:$8 sps:$4 sm:$0xff]   ;;  %s2260_s13 = scalar_select %p2254_p13, 1, 0 }
  0x6b   :  { %s2249_s11 = smul.f32 0.0001, %s2248_s10  ;;  %p4162_p4 = pnand %p4161_p3, %p4155_p0 }
  0x6c   :  { %2353 = vmatpush1.bf16.msra.mxu1 %v3556_v47  ;;  %v3632_v47 = vld [vmem:[#allocation7 + $0x174] ss:$8 sps:$4 sm:$0xff]  }
  0x6d   :  { %2737 = vmatpush1.bf16.msra.mxu0 %v3557_v48  ;;  %2355 = vmatprep.subr.bf16.mxu1 %v3558_v50  ;;  %v3635_v48 = vld [vmem:[#allocation7 + $0x774] ss:$8 sps:$4 sm:$0xff]   ;;  %v3634_v50 = vld [vmem:[#allocation7 + $0x170] ss:$8 sps:$4 sm:$0xff]  }
  0x6e   :  { %2739 = vmatprep.subr.bf16.mxu0 %v3560_v51  ;;  %v3637_v51 = vld [vmem:[#allocation7 + $0x770] ss:$8 sps:$4 sm:$0xff]  }
  0x70   :  { %2357 = vmatpush1.bf16.msra.mxu1 %v3562_v53  ;;  %v3641_v53 = vld [vmem:[#allocation7 + $0x784] ss:$8 sps:$4 sm:$0xff]  }
  0x71   :  { %2741 = vmatpush1.bf16.msra.mxu0 %v3563_v55  ;;  %2359 = vmatprep.subr.bf16.mxu1 %v3564_v57  ;;  %v3643_v55 = vld [vmem:[#allocation7 + $0x780] ss:$8 sps:$4 sm:$0xff]   ;;  %v3647_v57 = vld [vmem:[#allocation7 + $0x794] ss:$8 sps:$4 sm:$0xff]  }
  0x72   :  { %2743 = vmatprep.subr.bf16.mxu0 %v3566_v58  ;;  %v3646_v58 = vld [vmem:[#allocation7 + $0x190] ss:$8 sps:$4 sm:$0xff]  }
  0x74   :  { %2361 = vmatpush1.bf16.msra.mxu1 %v3568_v62  ;;  %v3652_v62 = vld [vmem:[#allocation7 + $0x1a0] ss:$8 sps:$4 sm:$0xff]  }
  0x75   :  { %2745 = vmatpush1.bf16.msra.mxu0 %v3569_v63  ;;  %2363 = vmatprep.subr.bf16.mxu1 %v3570_v0  ;;  %v3655_v63 = vld [vmem:[#allocation7 + $0x7a0] ss:$8 sps:$4 sm:$0xff]   ;;  %v3656_v0 = vld [vmem:[#allocation7 + $0x1b4] ss:$8 sps:$4 sm:$0xff]  }
  0x76   :  { %2747 = vmatprep.subr.bf16.mxu0 %v3572_v1  ;;  %v3659_v1 = vld [vmem:[#allocation7 + $0x7b4] ss:$8 sps:$4 sm:$0xff]  }
  0x78   :  { %2365 = vmatpush1.bf16.msra.mxu1 %v3574_v2  ;;  %v3658_v2 = vld [vmem:[#allocation7 + $0x1b0] ss:$8 sps:$4 sm:$0xff]  }
  0x79   :  { %2749 = vmatpush1.bf16.msra.mxu0 %v3575_v3  ;;  %2367 = vmatprep.subr.bf16.mxu1 %v3576_v4  ;;  %v3661_v3 = vld [vmem:[#allocation7 + $0x7b0] ss:$8 sps:$4 sm:$0xff]   ;;  %v3662_v4 = vld [vmem:[#allocation7 + $0x1c4] ss:$8 sps:$4 sm:$0xff]  }
  0x7a   :  { %2751 = vmatprep.subr.bf16.mxu0 %v3578_v5  ;;  %v3665_v5 = vld [vmem:[#allocation7 + $0x7c4] ss:$8 sps:$4 sm:$0xff]  }
  0x7c   :  { %2369 = vmatpush1.bf16.msra.mxu1 %v3580_v6  ;;  %v3664_v6 = vld [vmem:[#allocation7 + $0x1c0] ss:$8 sps:$4 sm:$0xff]  }
  0x7d   :  { %2753 = vmatpush1.bf16.msra.mxu0 %v3581_v7  ;;  %2371 = vmatprep.subr.bf16.mxu1 %v3582_v8  ;;  %v3667_v7 = vld [vmem:[#allocation7 + $0x7c0] ss:$8 sps:$4 sm:$0xff]   ;;  %v3668_v8 = vld [vmem:[#allocation7 + $0x1d4] ss:$8 sps:$4 sm:$0xff]  }
  0x7e   :  { %2755 = vmatprep.subr.bf16.mxu0 %v3584_v9  ;;  %v3671_v9 = vld [vmem:[#allocation7 + $0x7d4] ss:$8 sps:$4 sm:$0xff]  }
  0x80   :  { %2373 = vmatpush1.bf16.msra.mxu1 %v3586_v12  ;;  %v3674_v12 = vld [vmem:[#allocation7 + $0x1e4] ss:$8 sps:$4 sm:$0xff]  }
  0x81   :  { %2757 = vmatpush1.bf16.msra.mxu0 %v3587_v13  ;;  %2375 = vmatprep.subr.bf16.mxu1 %v3589_v14  ;;  %v3677_v13 = vld [vmem:[#allocation7 + $0x7e4] ss:$8 sps:$4 sm:$0xff]   ;;  %v3676_v14 = vld [vmem:[#allocation7 + $0x1e0] ss:$8 sps:$4 sm:$0xff]  }
  0x82   :  { %2759 = vmatprep.subr.bf16.mxu0 %v3593_v15  ;;  %v3679_v15 = vld [vmem:[#allocation7 + $0x7e0] ss:$8 sps:$4 sm:$0xff]  }
  0x83   :  { %1421 = vmatmul.mubr.f32.vlgmr.msra.gmra.mrb[0].mxu1 %v1237_v54  ;;  %v3640_v54 = vld [vmem:[#allocation7 + $0x180] ss:$8 sps:$4 sm:$0xff]  }
  0x84   :  { %1847 = vmatmul.mubr.f32.vlgmr.msra.gmra.mrb[0].mxu0 %v1288_v60  ;;  %2377 = vmatpush1.bf16.msra.mxu1 %v3591_v18  ;;  %v3650_v60 = vld [vmem:[#allocation7 + $0x1a4] ss:$8 sps:$4 sm:$0xff]   ;;  %v3680_v18 = vld [vmem:[#allocation7 + $0x1f4] ss:$8 sps:$4 sm:$0xff]  }
  0x85   :  { %2761 = vmatpush1.bf16.msra.mxu0 %v3595_v19  ;;  %2379 = vmatprep.subr.bf16.mxu1 %v3596_v20  ;;  %v3683_v19 = vld [vmem:[#allocation7 + $0x7f4] ss:$8 sps:$4 sm:$0xff]   ;;  %v3682_v20 = vld [vmem:[#allocation7 + $0x1f0] ss:$8 sps:$4 sm:$0xff]  }
  0x86   :  { %2763 = vmatprep.subr.bf16.mxu0 %v3599_v21  ;;  %1491 = vmatprep.mubr.f32.mxu1 %v1246_v22  ;;  %v3685_v21 = vld [vmem:[#allocation7 + $0x7f0] ss:$8 sps:$4 sm:$0xff]   ;;  %v3686_v22 = vld [vmem:[#allocation7 + $0x204] ss:$8 sps:$4 sm:$0xff]  }
  0x87   :  { %1917 = vmatprep.mubr.f32.mxu0 %v1297_v23  ;;  %v3689_v23 = vld [vmem:[#allocation7 + $0x804] ss:$8 sps:$4 sm:$0xff]  }
  0x88   :  { %2381 = vmatpush1.bf16.msra.mxu1 %v3598_v24  ;;  %v3688_v24 = vld [vmem:[#allocation7 + $0x200] ss:$8 sps:$4 sm:$0xff]  }
  0x89   :  { %2765 = vmatpush1.bf16.msra.mxu0 %v3601_v25  ;;  %2383 = vmatprep.subr.bf16.mxu1 %v3602_v26  ;;  %v3691_v25 = vld [vmem:[#allocation7 + $0x800] ss:$8 sps:$4 sm:$0xff]   ;;  %v3692_v26 = vld [vmem:[#allocation7 + $0x214] ss:$8 sps:$4 sm:$0xff]  }
  0x8a   :  { %2767 = vmatprep.subr.bf16.mxu0 %v3605_v27  ;;  %v4282_v27 = vld [vmem:[#allocation6 + $0x8] sm:$0xff] }
  0x8c   :  { %2385 = vmatpush1.bf16.msra.mxu1 %v3604_v28  ;;  %v3695_v28 = vld [vmem:[#allocation7 + $0x814] ss:$8 sps:$4 sm:$0xff]  }
  0x8d   :  { %2769 = vmatpush1.bf16.msra.mxu0 %v3607_v29  ;;  %2387 = vmatprep.subr.bf16.mxu1 %v3608_v30  ;;  %v4286_v29 = vrot.slane %v4282_v27, %v4268_v49  ;;  %v4288_v30 = vld [vmem:[#allocation6 + $0x20] sm:$0xff] }
  0x8e   :  { %2771 = vmatprep.subr.bf16.mxu0 %v3611_v31  ;;  %v3694_v31 = vld [vmem:[#allocation7 + $0x210] ss:$8 sps:$4 sm:$0xff]  }
  0x90   :  { %2389 = vmatpush1.bf16.msra.mxu1 %v3610_v32  ;;  %v3697_v32 = vld [vmem:[#allocation7 + $0x810] ss:$8 sps:$4 sm:$0xff]  }
  0x91   :  { %2773 = vmatpush1.bf16.msra.mxu0 %v3613_v33  ;;  %2391 = vmatprep.subr.bf16.mxu1 %v3614_v34  ;;  %v1262_v33 = vcombine.high %v4286_v29, %v4286_v29  ;;  %v4296_v34 = vrot.slane %v4288_v30, %v4268_v49 }
  0x92   :  { %2775 = vmatprep.subr.bf16.mxu0 %v3617_v35  ;;  %v3698_v35 = vld [vmem:[#allocation7 + $0x224] ss:$8 sps:$4 sm:$0xff]  }
  0x94   :  { %2393 = vmatpush1.bf16.msra.mxu1 %v3616_v36  ;;  %v3701_v36 = vld [vmem:[#allocation7 + $0x824] ss:$8 sps:$4 sm:$0xff]  }
  0x95   :  { %2777 = vmatpush1.bf16.msra.mxu0 %v3619_v37  ;;  %2395 = vmatprep.subr.bf16.mxu1 %v3620_v38  ;;  %v3703_v37 = vld [vmem:[#allocation7 + $0x820] ss:$8 sps:$4 sm:$0xff]   ;;  %v3704_v38 = vld [vmem:[#allocation7 + $0x234] ss:$8 sps:$4 sm:$0xff]  }
  0x96   :  { %2779 = vmatprep.subr.bf16.mxu0 %v3623_v39  ;;  %v3707_v39 = vld [vmem:[#allocation7 + $0x834] ss:$8 sps:$4 sm:$0xff]  }
  0x98   :  { %2397 = vmatpush1.bf16.msra.mxu1 %v3622_v40  ;;  %v3706_v40 = vld [vmem:[#allocation7 + $0x230] ss:$8 sps:$4 sm:$0xff]  }
  0x99   :  { %2781 = vmatpush1.bf16.msra.mxu0 %v3625_v41  ;;  %2399 = vmatprep.subr.bf16.mxu1 %v3626_v42  ;;  %v3709_v41 = vld [vmem:[#allocation7 + $0x830] ss:$8 sps:$4 sm:$0xff]   ;;  %v3710_v42 = vld [vmem:[#allocation7 + $0x244] ss:$8 sps:$4 sm:$0xff]  }
  0x9a   :  { %2783 = vmatprep.subr.bf16.mxu0 %v3629_v44  ;;  %v3713_v44 = vld [vmem:[#allocation7 + $0x844] ss:$8 sps:$4 sm:$0xff]  }
  0x9c   :  { %2401 = vmatpush1.bf16.msra.mxu1 %v3628_v45  ;;  %v3712_v45 = vld [vmem:[#allocation7 + $0x240] ss:$8 sps:$4 sm:$0xff]  }
  0x9d   :  { %2785 = vmatpush1.bf16.msra.mxu0 %v3631_v46  ;;  %2403 = vmatprep.subr.bf16.mxu1 %v3632_v47  ;;  %v3715_v46 = vld [vmem:[#allocation7 + $0x840] ss:$8 sps:$4 sm:$0xff]   ;;  %v3716_v47 = vld [vmem:[#allocation7 + $0x254] ss:$8 sps:$4 sm:$0xff]  }
  0x9e   :  { %2787 = vmatprep.subr.bf16.mxu0 %v3635_v48  ;;  %v3719_v48 = vld [vmem:[#allocation7 + $0x854] ss:$8 sps:$4 sm:$0xff]  }
  0xa0   :  { %2405 = vmatpush1.bf16.msra.mxu1 %v3634_v50  ;;  %v3718_v50 = vld [vmem:[#allocation7 + $0x250] ss:$8 sps:$4 sm:$0xff]  }
  0xa1   :  { %2789 = vmatpush1.bf16.msra.mxu0 %v3637_v51  ;;  %2407 = vmatprep.subr.bf16.mxu1 %v3638_v52  ;;  %v3721_v51 = vld [vmem:[#allocation7 + $0x850] ss:$8 sps:$4 sm:$0xff]   ;;  %v3722_v52 = vld [vmem:[#allocation7 + $0x264] ss:$8 sps:$4 sm:$0xff]  }
  0xa2   :  { %2791 = vmatprep.subr.bf16.mxu0 %v3641_v53  ;;  %v3725_v53 = vld [vmem:[#allocation7 + $0x864] ss:$8 sps:$4 sm:$0xff]  }
  0xa4   :  { %2409 = vmatpush1.bf16.msra.mxu1 %v3640_v54  ;;  %v3724_v54 = vld [vmem:[#allocation7 + $0x260] ss:$8 sps:$4 sm:$0xff]  }
  0xa5   :  { %2793 = vmatpush1.bf16.msra.mxu0 %v3643_v55  ;;  %2411 = vmatprep.subr.bf16.mxu1 %v3644_v56  ;;  %v3727_v55 = vld [vmem:[#allocation7 + $0x860] ss:$8 sps:$4 sm:$0xff]   ;;  %v3728_v56 = vld [vmem:[#allocation7 + $0x274] ss:$8 sps:$4 sm:$0xff]  }
  0xa6   :  { %2795 = vmatprep.subr.bf16.mxu0 %v3647_v57  ;;  %v3731_v57 = vld [vmem:[#allocation7 + $0x874] ss:$8 sps:$4 sm:$0xff]  }
  0xa8   :  { %2413 = vmatpush1.bf16.msra.mxu1 %v3646_v58  ;;  %v3730_v58 = vld [vmem:[#allocation7 + $0x270] ss:$8 sps:$4 sm:$0xff]  }
  0xa9   :  { %2797 = vmatpush1.bf16.msra.mxu0 %v3649_v59  ;;  %2415 = vmatprep.subr.bf16.mxu1 %v3650_v60  ;;  %v3733_v59 = vld [vmem:[#allocation7 + $0x870] ss:$8 sps:$4 sm:$0xff]   ;;  %v3734_v60 = vld [vmem:[#allocation7 + $0x284] ss:$8 sps:$4 sm:$0xff]  }
  0xaa   :  { %2799 = vmatprep.subr.bf16.mxu0 %v3653_v61  ;;  %v3737_v61 = vld [vmem:[#allocation7 + $0x884] ss:$8 sps:$4 sm:$0xff]  }
  0xac   :  { %2417 = vmatpush1.bf16.msra.mxu1 %v3652_v62  ;;  %v3736_v62 = vld [vmem:[#allocation7 + $0x280] ss:$8 sps:$4 sm:$0xff]  }
  0xad   :  { %2801 = vmatpush1.bf16.msra.mxu0 %v3655_v63  ;;  %2419 = vmatprep.subr.bf16.mxu1 %v3656_v0  ;;  %v3739_v63 = vld [vmem:[#allocation7 + $0x880] ss:$8 sps:$4 sm:$0xff]   ;;  %v3740_v0 = vld [vmem:[#allocation7 + $0x294] ss:$8 sps:$4 sm:$0xff]  }
  0xae   :  { %2803 = vmatprep.subr.bf16.mxu0 %v3659_v1  ;;  %v3743_v1 = vld [vmem:[#allocation7 + $0x894] ss:$8 sps:$4 sm:$0xff]  }
  0xb0   :  { %2421 = vmatpush1.bf16.msra.mxu1 %v3658_v2  ;;  %v3742_v2 = vld [vmem:[#allocation7 + $0x290] ss:$8 sps:$4 sm:$0xff]  }
  0xb1   :  { %2805 = vmatpush1.bf16.msra.mxu0 %v3661_v3  ;;  %2423 = vmatprep.subr.bf16.mxu1 %v3662_v4  ;;  %v3745_v3 = vld [vmem:[#allocation7 + $0x890] ss:$8 sps:$4 sm:$0xff]   ;;  %v3746_v4 = vld [vmem:[#allocation7 + $0x2a4] ss:$8 sps:$4 sm:$0xff]  }
  0xb2   :  { %2807 = vmatprep.subr.bf16.mxu0 %v3665_v5  ;;  %v3749_v5 = vld [vmem:[#allocation7 + $0x8a4] ss:$8 sps:$4 sm:$0xff]  }
  0xb4   :  { %2425 = vmatpush1.bf16.msra.mxu1 %v3664_v6  ;;  %v3748_v6 = vld [vmem:[#allocation7 + $0x2a0] ss:$8 sps:$4 sm:$0xff]  }
  0xb5   :  { %2809 = vmatpush1.bf16.msra.mxu0 %v3667_v7  ;;  %2427 = vmatprep.subr.bf16.mxu1 %v3668_v8  ;;  %v3751_v7 = vld [vmem:[#allocation7 + $0x8a0] ss:$8 sps:$4 sm:$0xff]   ;;  %v3752_v8 = vld [vmem:[#allocation7 + $0x2b4] ss:$8 sps:$4 sm:$0xff]  }
  0xb6   :  { %2811 = vmatprep.subr.bf16.mxu0 %v3671_v9  ;;  %v3755_v9 = vld [vmem:[#allocation7 + $0x8b4] ss:$8 sps:$4 sm:$0xff]  }
  0xb8   :  { %2429 = vmatpush1.bf16.msra.mxu1 %v3670_v10  ;;  %v3754_v10 = vld [vmem:[#allocation7 + $0x2b0] ss:$8 sps:$4 sm:$0xff]  }
  0xb9   :  { %2813 = vmatpush1.bf16.msra.mxu0 %v3673_v11  ;;  %2431 = vmatprep.subr.bf16.mxu1 %v3674_v12  ;;  %v3757_v11 = vld [vmem:[#allocation7 + $0x8b0] ss:$8 sps:$4 sm:$0xff]   ;;  %v3758_v12 = vld [vmem:[#allocation7 + $0x2c4] ss:$8 sps:$4 sm:$0xff]  }
  0xba   :  { %2815 = vmatprep.subr.bf16.mxu0 %v3677_v13  ;;  %v3761_v13 = vld [vmem:[#allocation7 + $0x8c4] ss:$8 sps:$4 sm:$0xff]  }
  0xbc   :  { %2433 = vmatpush1.bf16.msra.mxu1 %v3676_v14  ;;  %v3760_v14 = vld [vmem:[#allocation7 + $0x2c0] ss:$8 sps:$4 sm:$0xff]  }
  0xbd   :  { %2817 = vmatpush1.bf16.msra.mxu0 %v3679_v15  ;;  %2435 = vmatprep.subr.bf16.mxu1 %v3680_v18  ;;  %v3763_v15 = vld [vmem:[#allocation7 + $0x8c0] ss:$8 sps:$4 sm:$0xff]   ;;  %v3764_v18 = vld [vmem:[#allocation7 + $0x2d4] ss:$8 sps:$4 sm:$0xff]  }
  0xbe   :  { %2819 = vmatprep.subr.bf16.mxu0 %v3683_v19  ;;  %v3767_v19 = vld [vmem:[#allocation7 + $0x8d4] ss:$8 sps:$4 sm:$0xff]  }
  0xc0   :  { %2437 = vmatpush1.bf16.msra.mxu1 %v3682_v20  ;;  %v3766_v20 = vld [vmem:[#allocation7 + $0x2d0] ss:$8 sps:$4 sm:$0xff]  }
  0xc1   :  { %2821 = vmatpush1.bf16.msra.mxu0 %v3685_v21  ;;  %2439 = vmatprep.subr.bf16.mxu1 %v3686_v22  ;;  %v3769_v21 = vld [vmem:[#allocation7 + $0x8d0] ss:$8 sps:$4 sm:$0xff]   ;;  %v3770_v22 = vld [vmem:[#allocation7 + $0x2e4] ss:$8 sps:$4 sm:$0xff]  }
  0xc2   :  { %2823 = vmatprep.subr.bf16.mxu0 %v3689_v23  ;;  %v3773_v23 = vld [vmem:[#allocation7 + $0x8e4] ss:$8 sps:$4 sm:$0xff]  }
  0xc3   :  { %1492 = vmatmul.mubr.f32.vlgmr.msra.gmra.mrb[0].mxu1 %v4273_v16  ;;  %v1313_v16 = vcombine.high %v4296_v34, %v4296_v34 }
  0xc4   :  { %1918 = vmatmul.mubr.f32.vlgmr.msra.gmra.mrb[0].mxu0 %v4276_v17  ;;  %2441 = vmatpush1.bf16.msra.mxu1 %v3688_v24  ;;  %v3700_v17 = vld [vmem:[#allocation7 + $0x220] ss:$8 sps:$4 sm:$0xff]  }
  0xc5   :  { %2825 = vmatpush1.bf16.msra.mxu0 %v3691_v25  ;;  %2443 = vmatprep.subr.bf16.mxu1 %v3692_v26  ;;  %v3772_v24 = vld [vmem:[#allocation7 + $0x2e0] ss:$8 sps:$4 sm:$0xff]   ;;  %v3776_v26 = vld [vmem:[#allocation7 + $0x2f4] ss:$8 sps:$4 sm:$0xff]  }
  0xc6   :  { %2827 = vmatprep.subr.bf16.mxu0 %v3695_v28  ;;  %1562 = vmatprep.mubr.f32.mxu1 %v1262_v33  ;;  %v3775_v25 = vld [vmem:[#allocation7 + $0x8e0] ss:$8 sps:$4 sm:$0xff]   ;;  %v3779_v28 = vld [vmem:[#allocation7 + $0x8f4] ss:$8 sps:$4 sm:$0xff]   ;;  %v3778_v33 = vld [vmem:[#allocation7 + $0x2f0] ss:$8 sps:$4 sm:$0xff]  }
  0xc7   :  { %1988 = vmatprep.mubr.f32.mxu0 %v1313_v16  ;;  %v3785_v16 = vld [vmem:[#allocation7 + $0x904] ss:$8 sps:$4 sm:$0xff]  }
  0xc8   :  { %2445 = vmatpush1.bf16.msra.mxu1 %v3694_v31  ;;  %v1247_v31 = vcombine.high %v4282_v27, %v4282_v27  ;;  %v3788_v27 = vld [vmem:[#allocation7 + $0x314] ss:$8 sps:$4 sm:$0xff]  }
  0xc9   :  { %2829 = vmatpush1.bf16.msra.mxu0 %v3697_v32  ;;  %2447 = vmatprep.subr.bf16.mxu1 %v3698_v35  ;;  %v1298_v32 = vcombine.high %v4288_v30, %v4288_v30  ;;  %v3781_v35 = vld [vmem:[#allocation7 + $0x8f0] ss:$8 sps:$4 sm:$0xff]   ;;  %v3791_v30 = vld [vmem:[#allocation7 + $0x914] ss:$8 sps:$4 sm:$0xff]  }
  0xca   :  { %2831 = vmatprep.subr.bf16.mxu0 %v3701_v36  ;;  %v3782_v36 = vld [vmem:[#allocation7 + $0x304] ss:$8 sps:$4 sm:$0xff]  }
  0xcc   :  { %2449 = vmatpush1.bf16.msra.mxu1 %v3700_v17  ;;  %v4305_v17 = vrot.slane %v1247_v31, %v4268_v49  ;;  %v3862_v31 = vld [vmem:[#allocation7 + $0x3d0] ss:$8 sps:$4 sm:$0xff]  }
  0xcd   :  { %2833 = vmatpush1.bf16.msra.mxu0 %v3703_v37  ;;  %2451 = vmatprep.subr.bf16.mxu1 %v3704_v38  ;;  %v4308_v37 = vrot.slane %v1298_v32, %v4268_v49  ;;  %v3784_v38 = vld [vmem:[#allocation7 + $0x300] ss:$8 sps:$4 sm:$0xff]   ;;  %v3865_v32 = vld [vmem:[#allocation7 + $0x9d0] ss:$8 sps:$4 sm:$0xff]  }
  0xce   :  { %2835 = vmatprep.subr.bf16.mxu0 %v3707_v39  ;;  %v3787_v39 = vld [vmem:[#allocation7 + $0x900] ss:$8 sps:$4 sm:$0xff]  }
  0xd0   :  { %2453 = vmatpush1.bf16.msra.mxu1 %v3706_v40  ;;  %v1263_v40 = vcombine.high %v4305_v17, %v4305_v17 }
  0xd1   :  { %2837 = vmatpush1.bf16.msra.mxu0 %v3709_v41  ;;  %2455 = vmatprep.subr.bf16.mxu1 %v3710_v42  ;;  %v1314_v41 = vcombine.high %v4308_v37, %v4308_v37  ;;  %v3790_v42 = vld [vmem:[#allocation7 + $0x310] ss:$8 sps:$4 sm:$0xff]  }
  0xd2   :  { %2839 = vmatprep.subr.bf16.mxu0 %v3713_v44  ;;  %v3793_v44 = vld [vmem:[#allocation7 + $0x910] ss:$8 sps:$4 sm:$0xff]  }
  0xd4   :  { %2457 = vmatpush1.bf16.msra.mxu1 %v3712_v45  ;;  %v3794_v45 = vld [vmem:[#allocation7 + $0x324] ss:$8 sps:$4 sm:$0xff]  }
  0xd5   :  { %2841 = vmatpush1.bf16.msra.mxu0 %v3715_v46  ;;  %2459 = vmatprep.subr.bf16.mxu1 %v3716_v47  ;;  %v3797_v46 = vld [vmem:[#allocation7 + $0x924] ss:$8 sps:$4 sm:$0xff]   ;;  %v3796_v47 = vld [vmem:[#allocation7 + $0x320] ss:$8 sps:$4 sm:$0xff]  }
  0xd6   :  { %2843 = vmatprep.subr.bf16.mxu0 %v3719_v48  ;;  %v3799_v48 = vld [vmem:[#allocation7 + $0x920] ss:$8 sps:$4 sm:$0xff]  }
  0xd8   :  { %2461 = vmatpush1.bf16.msra.mxu1 %v3718_v50  ;;  %v3800_v50 = vld [vmem:[#allocation7 + $0x334] ss:$8 sps:$4 sm:$0xff]  }
  0xd9   :  { %2845 = vmatpush1.bf16.msra.mxu0 %v3721_v51  ;;  %2463 = vmatprep.subr.bf16.mxu1 %v3722_v52  ;;  %v3802_v51 = vld [vmem:[#allocation7 + $0x330] ss:$8 sps:$4 sm:$0xff]   ;;  %v3806_v52 = vld [vmem:[#allocation7 + $0x344] ss:$8 sps:$4 sm:$0xff]  }
  0xda   :  { %2847 = vmatprep.subr.bf16.mxu0 %v3725_v53  ;;  %v3809_v53 = vld [vmem:[#allocation7 + $0x944] ss:$8 sps:$4 sm:$0xff]  }
  0xdc   :  { %2465 = vmatpush1.bf16.msra.mxu1 %v3724_v54  ;;  %v3808_v54 = vld [vmem:[#allocation7 + $0x340] ss:$8 sps:$4 sm:$0xff]  }
  0xdd   :  { %2849 = vmatpush1.bf16.msra.mxu0 %v3727_v55  ;;  %2467 = vmatprep.subr.bf16.mxu1 %v3728_v56  ;;  %v3811_v55 = vld [vmem:[#allocation7 + $0x940] ss:$8 sps:$4 sm:$0xff]   ;;  %v3812_v56 = vld [vmem:[#allocation7 + $0x354] ss:$8 sps:$4 sm:$0xff]  }
  0xde   :  { %2851 = vmatprep.subr.bf16.mxu0 %v3731_v57  ;;  %v3815_v57 = vld [vmem:[#allocation7 + $0x954] ss:$8 sps:$4 sm:$0xff]  }
  0xe0   :  { %2469 = vmatpush1.bf16.msra.mxu1 %v3730_v58  ;;  %v3814_v58 = vld [vmem:[#allocation7 + $0x350] ss:$8 sps:$4 sm:$0xff]  }
  0xe1   :  { %2853 = vmatpush1.bf16.msra.mxu0 %v3733_v59  ;;  %2471 = vmatprep.subr.bf16.mxu1 %v3734_v60  ;;  %v3817_v59 = vld [vmem:[#allocation7 + $0x950] ss:$8 sps:$4 sm:$0xff]   ;;  %v3818_v60 = vld [vmem:[#allocation7 + $0x364] ss:$8 sps:$4 sm:$0xff]  }
  0xe2   :  { %2855 = vmatprep.subr.bf16.mxu0 %v3737_v61  ;;  %v3821_v61 = vld [vmem:[#allocation7 + $0x964] ss:$8 sps:$4 sm:$0xff]  }
  0xe4   :  { %2473 = vmatpush1.bf16.msra.mxu1 %v3736_v62  ;;  %v3820_v62 = vld [vmem:[#allocation7 + $0x360] ss:$8 sps:$4 sm:$0xff]  }
  0xe5   :  { %2857 = vmatpush1.bf16.msra.mxu0 %v3739_v63  ;;  %2475 = vmatprep.subr.bf16.mxu1 %v3740_v0  ;;  %v3823_v63 = vld [vmem:[#allocation7 + $0x960] ss:$8 sps:$4 sm:$0xff]   ;;  %v3824_v0 = vld [vmem:[#allocation7 + $0x374] ss:$8 sps:$4 sm:$0xff]  }
  0xe6   :  { %2859 = vmatprep.subr.bf16.mxu0 %v3743_v1  ;;  %v3827_v1 = vld [vmem:[#allocation7 + $0x974] ss:$8 sps:$4 sm:$0xff]  }
  0xe8   :  { %2477 = vmatpush1.bf16.msra.mxu1 %v3742_v2  ;;  %v3826_v2 = vld [vmem:[#allocation7 + $0x370] ss:$8 sps:$4 sm:$0xff]  }
  0xe9   :  { %2861 = vmatpush1.bf16.msra.mxu0 %v3745_v3  ;;  %2479 = vmatprep.subr.bf16.mxu1 %v3746_v4  ;;  %v3829_v3 = vld [vmem:[#allocation7 + $0x970] ss:$8 sps:$4 sm:$0xff]   ;;  %v3830_v4 = vld [vmem:[#allocation7 + $0x384] ss:$8 sps:$4 sm:$0xff]  }
  0xea   :  { %2863 = vmatprep.subr.bf16.mxu0 %v3749_v5  ;;  %v3833_v5 = vld [vmem:[#allocation7 + $0x984] ss:$8 sps:$4 sm:$0xff]  }
  0xec   :  { %2481 = vmatpush1.bf16.msra.mxu1 %v3748_v6  ;;  %v3832_v6 = vld [vmem:[#allocation7 + $0x380] ss:$8 sps:$4 sm:$0xff]  }
  0xed   :  { %2865 = vmatpush1.bf16.msra.mxu0 %v3751_v7  ;;  %2483 = vmatprep.subr.bf16.mxu1 %v3752_v8  ;;  %v3835_v7 = vld [vmem:[#allocation7 + $0x980] ss:$8 sps:$4 sm:$0xff]   ;;  %v3836_v8 = vld [vmem:[#allocation7 + $0x394] ss:$8 sps:$4 sm:$0xff]  }
  0xee   :  { %2867 = vmatprep.subr.bf16.mxu0 %v3755_v9  ;;  %v3839_v9 = vld [vmem:[#allocation7 + $0x994] ss:$8 sps:$4 sm:$0xff]  }
  0xf0   :  { %2485 = vmatpush1.bf16.msra.mxu1 %v3754_v10  ;;  %v3838_v10 = vld [vmem:[#allocation7 + $0x390] ss:$8 sps:$4 sm:$0xff]  }
  0xf1   :  { %2869 = vmatpush1.bf16.msra.mxu0 %v3757_v11  ;;  %2487 = vmatprep.subr.bf16.mxu1 %v3758_v12  ;;  %v3841_v11 = vld [vmem:[#allocation7 + $0x990] ss:$8 sps:$4 sm:$0xff]   ;;  %v3842_v12 = vld [vmem:[#allocation7 + $0x3a4] ss:$8 sps:$4 sm:$0xff]  }
  0xf2   :  { %2871 = vmatprep.subr.bf16.mxu0 %v3761_v13  ;;  %v3845_v13 = vld [vmem:[#allocation7 + $0x9a4] ss:$8 sps:$4 sm:$0xff]  }
  0xf4   :  { %2489 = vmatpush1.bf16.msra.mxu1 %v3760_v14  ;;  %v3844_v14 = vld [vmem:[#allocation7 + $0x3a0] ss:$8 sps:$4 sm:$0xff]  }
  0xf5   :  { %2873 = vmatpush1.bf16.msra.mxu0 %v3763_v15  ;;  %2491 = vmatprep.subr.bf16.mxu1 %v3764_v18  ;;  %v3847_v15 = vld [vmem:[#allocation7 + $0x9a0] ss:$8 sps:$4 sm:$0xff]   ;;  %v3848_v18 = vld [vmem:[#allocation7 + $0x3b4] ss:$8 sps:$4 sm:$0xff]  }
  0xf6   :  { %2875 = vmatprep.subr.bf16.mxu0 %v3767_v19  ;;  %v3851_v19 = vld [vmem:[#allocation7 + $0x9b4] ss:$8 sps:$4 sm:$0xff]  }
  0xf8   :  { %2493 = vmatpush1.bf16.msra.mxu1 %v3766_v20  ;;  %v3850_v20 = vld [vmem:[#allocation7 + $0x3b0] ss:$8 sps:$4 sm:$0xff]  }
  0xf9   :  { %2877 = vmatpush1.bf16.msra.mxu0 %v3769_v21  ;;  %2495 = vmatprep.subr.bf16.mxu1 %v3770_v22  ;;  %v3853_v21 = vld [vmem:[#allocation7 + $0x9b0] ss:$8 sps:$4 sm:$0xff]   ;;  %v3854_v22 = vld [vmem:[#allocation7 + $0x3c4] ss:$8 sps:$4 sm:$0xff]  }
  0xfa   :  { %2879 = vmatprep.subr.bf16.mxu0 %v3773_v23  ;;  %v3857_v23 = vld [vmem:[#allocation7 + $0x9c4] ss:$8 sps:$4 sm:$0xff]  }
  0xfc   :  { %2497 = vmatpush1.bf16.msra.mxu1 %v3772_v24  ;;  %v3856_v24 = vld [vmem:[#allocation7 + $0x3c0] ss:$8 sps:$4 sm:$0xff]  }
  0xfd   :  { %2881 = vmatpush1.bf16.msra.mxu0 %v3775_v25  ;;  %2499 = vmatprep.subr.bf16.mxu1 %v3776_v26  ;;  %v3859_v25 = vld [vmem:[#allocation7 + $0x9c0] ss:$8 sps:$4 sm:$0xff]   ;;  %v3860_v26 = vld [vmem:[#allocation7 + $0x3d4] ss:$8 sps:$4 sm:$0xff]  }
  0xfe   :  { %2883 = vmatprep.subr.bf16.mxu0 %v3779_v28  ;;  %v3863_v28 = vld [vmem:[#allocation7 + $0x9d4] ss:$8 sps:$4 sm:$0xff]  }
 0x100   :  { %2501 = vmatpush1.bf16.msra.mxu1 %v3778_v33  ;;  %v3866_v33 = vld [vmem:[#allocation7 + $0x3e4] ss:$8 sps:$4 sm:$0xff]  }
 0x101   :  { %2885 = vmatpush1.bf16.msra.mxu0 %v3781_v35  ;;  %2503 = vmatprep.subr.bf16.mxu1 %v3782_v36  ;;  %v3869_v35 = vld [vmem:[#allocation7 + $0x9e4] ss:$8 sps:$4 sm:$0xff]   ;;  %v3868_v36 = vld [vmem:[#allocation7 + $0x3e0] ss:$8 sps:$4 sm:$0xff]  }
 0x102   :  { %2887 = vmatprep.subr.bf16.mxu0 %v3785_v16  ;;  %v3871_v16 = vld [vmem:[#allocation7 + $0x9e0] ss:$8 sps:$4 sm:$0xff]  }
 0x103   :  { %1563 = vmatmul.mubr.f32.vlgmr.msra.gmra.mrb[0].mxu1 %v4286_v29  ;;  %v3803_v29 = vld [vmem:[#allocation7 + $0x934] ss:$8 sps:$4 sm:$0xff]  }
 0x104   :  { %1989 = vmatmul.mubr.f32.vlgmr.msra.gmra.mrb[0].mxu0 %v4296_v34  ;;  %2505 = vmatpush1.bf16.msra.mxu1 %v3784_v38  ;;  %v3805_v34 = vld [vmem:[#allocation7 + $0x930] ss:$8 sps:$4 sm:$0xff]   ;;  %v3872_v38 = vld [vmem:[#allocation7 + $0x3f4] ss:$8 sps:$4 sm:$0xff]  }
 0x105   :  { %2889 = vmatpush1.bf16.msra.mxu0 %v3787_v39  ;;  %2507 = vmatprep.subr.bf16.mxu1 %v3788_v27  ;;  %v3875_v39 = vld [vmem:[#allocation7 + $0x9f4] ss:$8 sps:$4 sm:$0xff]   ;;  %v4316_v27 = vld [vmem:[#allocation6 + $0x10] sm:$0xff] }
 0x106   :  { %2891 = vmatprep.subr.bf16.mxu0 %v3791_v30  ;;  %1633 = vmatprep.mubr.f32.mxu1 %v1263_v40  ;;  %v4318_v30 = vld [vmem:[#allocation6 + $0x28] sm:$0xff] }
 0x107   :  { %2059 = vmatprep.mubr.f32.mxu0 %v1314_v41  ;;  %v3874_v40 = vld [vmem:[#allocation7 + $0x3f0] ss:$8 sps:$4 sm:$0xff]  }
 0x108   :  { %2509 = vmatpush1.bf16.msra.mxu1 %v3790_v42  ;;  %v3877_v41 = vld [vmem:[#allocation7 + $0x9f0] ss:$8 sps:$4 sm:$0xff]   ;;  %v3879_v42 = vld [vmem:[#allocation7 + $0x404] ss:$8 sps:$4 sm:$0xff]  }
 0x109   :  { %2893 = vmatpush1.bf16.msra.mxu0 %v3793_v44  ;;  %2511 = vmatprep.subr.bf16.mxu1 %v3794_v45  ;;  %v3883_v44 = vld [vmem:[#allocation7 + $0xa04] ss:$8 sps:$4 sm:$0xff]   ;;  %v4322_v45 = vrot.slane %v4316_v27, %v4268_v49 }
 0x10a   :  { %2895 = vmatprep.subr.bf16.mxu0 %v3797_v46  ;;  %v4326_v46 = vrot.slane %v4318_v30, %v4268_v49 }
 0x10c   :  { %2513 = vmatpush1.bf16.msra.mxu1 %v3796_v47  ;;  %v3881_v47 = vld [vmem:[#allocation7 + $0x400] ss:$8 sps:$4 sm:$0xff]  }
 0x10d   :  { %2897 = vmatpush1.bf16.msra.mxu0 %v3799_v48  ;;  %2515 = vmatprep.subr.bf16.mxu1 %v3800_v50  ;;  %v3885_v48 = vld [vmem:[#allocation7 + $0xa00] ss:$8 sps:$4 sm:$0xff]   ;;  %v3886_v50 = vld [vmem:[#allocation7 + $0x414] ss:$8 sps:$4 sm:$0xff]  }
 0x10e   :  { %2899 = vmatprep.subr.bf16.mxu0 %v3803_v29  ;;  %v3889_v29 = vld [vmem:[#allocation7 + $0xa14] ss:$8 sps:$4 sm:$0xff]  }
 0x110   :  { %2517 = vmatpush1.bf16.msra.mxu1 %v3802_v51  ;;  %v1279_v51 = vcombine.high %v4322_v45, %v4322_v45 }
 0x111   :  { %2901 = vmatpush1.bf16.msra.mxu0 %v3805_v34  ;;  %2519 = vmatprep.subr.bf16.mxu1 %v3806_v52  ;;  %v1330_v34 = vcombine.high %v4326_v46, %v4326_v46  ;;  %v3888_v52 = vld [vmem:[#allocation7 + $0x410] ss:$8 sps:$4 sm:$0xff]  }
 0x112   :  { %2903 = vmatprep.subr.bf16.mxu0 %v3809_v53  ;;  %v3891_v53 = vld [vmem:[#allocation7 + $0xa10] ss:$8 sps:$4 sm:$0xff]  }
 0x114   :  { %2521 = vmatpush1.bf16.msra.mxu1 %v3808_v54  ;;  %v3892_v54 = vld [vmem:[#allocation7 + $0x424] ss:$8 sps:$4 sm:$0xff]  }
 0x115   :  { %2905 = vmatpush1.bf16.msra.mxu0 %v3811_v55  ;;  %2523 = vmatprep.subr.bf16.mxu1 %v3812_v56  ;;  %v3895_v55 = vld [vmem:[#allocation7 + $0xa24] ss:$8 sps:$4 sm:$0xff]   ;;  %v3894_v56 = vld [vmem:[#allocation7 + $0x420] ss:$8 sps:$4 sm:$0xff]  }
 0x116   :  { %2907 = vmatprep.subr.bf16.mxu0 %v3815_v57  ;;  %v3897_v57 = vld [vmem:[#allocation7 + $0xa20] ss:$8 sps:$4 sm:$0xff]  }
 0x118   :  { %2525 = vmatpush1.bf16.msra.mxu1 %v3814_v58  ;;  %v3898_v58 = vld [vmem:[#allocation7 + $0x434] ss:$8 sps:$4 sm:$0xff]  }
 0x119   :  { %2909 = vmatpush1.bf16.msra.mxu0 %v3817_v59  ;;  %2527 = vmatprep.subr.bf16.mxu1 %v3818_v60  ;;  %v3903_v59 = vld [vmem:[#allocation7 + $0xa30] ss:$8 sps:$4 sm:$0xff]   ;;  %v3904_v60 = vld [vmem:[#allocation7 + $0x444] ss:$8 sps:$4 sm:$0xff]  }
 0x11a   :  { %2911 = vmatprep.subr.bf16.mxu0 %v3821_v61  ;;  %v3907_v61 = vld [vmem:[#allocation7 + $0xa44] ss:$8 sps:$4 sm:$0xff]  }
 0x11c   :  { %2529 = vmatpush1.bf16.msra.mxu1 %v3820_v62  ;;  %v3906_v62 = vld [vmem:[#allocation7 + $0x440] ss:$8 sps:$4 sm:$0xff]  }
 0x11d   :  { %2913 = vmatpush1.bf16.msra.mxu0 %v3823_v63  ;;  %2531 = vmatprep.subr.bf16.mxu1 %v3824_v0  ;;  %v3909_v63 = vld [vmem:[#allocation7 + $0xa40] ss:$8 sps:$4 sm:$0xff]   ;;  %v3910_v0 = vld [vmem:[#allocation7 + $0x454] ss:$8 sps:$4 sm:$0xff]  }
 0x11e   :  { %2915 = vmatprep.subr.bf16.mxu0 %v3827_v1  ;;  %v3913_v1 = vld [vmem:[#allocation7 + $0xa54] ss:$8 sps:$4 sm:$0xff]  }
 0x120   :  { %2533 = vmatpush1.bf16.msra.mxu1 %v3826_v2  ;;  %v3912_v2 = vld [vmem:[#allocation7 + $0x450] ss:$8 sps:$4 sm:$0xff]  }
 0x121   :  { %2917 = vmatpush1.bf16.msra.mxu0 %v3829_v3  ;;  %2535 = vmatprep.subr.bf16.mxu1 %v3830_v4  ;;  %v3915_v3 = vld [vmem:[#allocation7 + $0xa50] ss:$8 sps:$4 sm:$0xff]   ;;  %v3916_v4 = vld [vmem:[#allocation7 + $0x464] ss:$8 sps:$4 sm:$0xff]  }
 0x122   :  { %2919 = vmatprep.subr.bf16.mxu0 %v3833_v5  ;;  %v3919_v5 = vld [vmem:[#allocation7 + $0xa64] ss:$8 sps:$4 sm:$0xff]  }
 0x124   :  { %2537 = vmatpush1.bf16.msra.mxu1 %v3832_v6  ;;  %v3918_v6 = vld [vmem:[#allocation7 + $0x460] ss:$8 sps:$4 sm:$0xff]  }
 0x125   :  { %2921 = vmatpush1.bf16.msra.mxu0 %v3835_v7  ;;  %2539 = vmatprep.subr.bf16.mxu1 %v3836_v8  ;;  %v3921_v7 = vld [vmem:[#allocation7 + $0xa60] ss:$8 sps:$4 sm:$0xff]   ;;  %v3922_v8 = vld [vmem:[#allocation7 + $0x474] ss:$8 sps:$4 sm:$0xff]  }
 0x126   :  { %2923 = vmatprep.subr.bf16.mxu0 %v3839_v9  ;;  %v3925_v9 = vld [vmem:[#allocation7 + $0xa74] ss:$8 sps:$4 sm:$0xff]  }
 0x128   :  { %2541 = vmatpush1.bf16.msra.mxu1 %v3838_v10  ;;  %v3924_v10 = vld [vmem:[#allocation7 + $0x470] ss:$8 sps:$4 sm:$0xff]  }
 0x129   :  { %2925 = vmatpush1.bf16.msra.mxu0 %v3841_v11  ;;  %2543 = vmatprep.subr.bf16.mxu1 %v3842_v12  ;;  %v3927_v11 = vld [vmem:[#allocation7 + $0xa70] ss:$8 sps:$4 sm:$0xff]   ;;  %v3928_v12 = vld [vmem:[#allocation7 + $0x484] ss:$8 sps:$4 sm:$0xff]  }
 0x12a   :  { %2927 = vmatprep.subr.bf16.mxu0 %v3845_v13  ;;  %v3931_v13 = vld [vmem:[#allocation7 + $0xa84] ss:$8 sps:$4 sm:$0xff]  }
 0x12c   :  { %2545 = vmatpush1.bf16.msra.mxu1 %v3844_v14  ;;  %v3930_v14 = vld [vmem:[#allocation7 + $0x480] ss:$8 sps:$4 sm:$0xff]  }
 0x12d   :  { %2929 = vmatpush1.bf16.msra.mxu0 %v3847_v15  ;;  %2547 = vmatprep.subr.bf16.mxu1 %v3848_v18  ;;  %v3933_v15 = vld [vmem:[#allocation7 + $0xa80] ss:$8 sps:$4 sm:$0xff]   ;;  %v3934_v18 = vld [vmem:[#allocation7 + $0x494] ss:$8 sps:$4 sm:$0xff]  }
 0x12e   :  { %2931 = vmatprep.subr.bf16.mxu0 %v3851_v19  ;;  %v3937_v19 = vld [vmem:[#allocation7 + $0xa94] ss:$8 sps:$4 sm:$0xff]  }
 0x130   :  { %2549 = vmatpush1.bf16.msra.mxu1 %v3850_v20  ;;  %v3936_v20 = vld [vmem:[#allocation7 + $0x490] ss:$8 sps:$4 sm:$0xff]  }
 0x131   :  { %2933 = vmatpush1.bf16.msra.mxu0 %v3853_v21  ;;  %2551 = vmatprep.subr.bf16.mxu1 %v3854_v22  ;;  %v3939_v21 = vld [vmem:[#allocation7 + $0xa90] ss:$8 sps:$4 sm:$0xff]   ;;  %v3940_v22 = vld [vmem:[#allocation7 + $0x4a4] ss:$8 sps:$4 sm:$0xff]  }
 0x132   :  { %2935 = vmatprep.subr.bf16.mxu0 %v3857_v23  ;;  %v3943_v23 = vld [vmem:[#allocation7 + $0xaa4] ss:$8 sps:$4 sm:$0xff]  }
 0x134   :  { %2553 = vmatpush1.bf16.msra.mxu1 %v3856_v24  ;;  %v3942_v24 = vld [vmem:[#allocation7 + $0x4a0] ss:$8 sps:$4 sm:$0xff]  }
 0x135   :  { %2937 = vmatpush1.bf16.msra.mxu0 %v3859_v25  ;;  %2555 = vmatprep.subr.bf16.mxu1 %v3860_v26  ;;  %v3945_v25 = vld [vmem:[#allocation7 + $0xaa0] ss:$8 sps:$4 sm:$0xff]   ;;  %v3946_v26 = vld [vmem:[#allocation7 + $0x4b4] ss:$8 sps:$4 sm:$0xff]  }
 0x136   :  { %2939 = vmatprep.subr.bf16.mxu0 %v3863_v28  ;;  %v3949_v28 = vld [vmem:[#allocation7 + $0xab4] ss:$8 sps:$4 sm:$0xff]  }
 0x138   :  { %2557 = vmatpush1.bf16.msra.mxu1 %v3862_v31  ;;  %v3948_v31 = vld [vmem:[#allocation7 + $0x4b0] ss:$8 sps:$4 sm:$0xff]  }
 0x139   :  { %2941 = vmatpush1.bf16.msra.mxu0 %v3865_v32  ;;  %2559 = vmatprep.subr.bf16.mxu1 %v3866_v33  ;;  %v3951_v32 = vld [vmem:[#allocation7 + $0xab0] ss:$8 sps:$4 sm:$0xff]   ;;  %v3952_v33 = vld [vmem:[#allocation7 + $0x4c4] ss:$8 sps:$4 sm:$0xff]  }
 0x13a   :  { %2943 = vmatprep.subr.bf16.mxu0 %v3869_v35  ;;  %v3955_v35 = vld [vmem:[#allocation7 + $0xac4] ss:$8 sps:$4 sm:$0xff]  }
 0x13c   :  { %2561 = vmatpush1.bf16.msra.mxu1 %v3868_v36  ;;  %v3954_v36 = vld [vmem:[#allocation7 + $0x4c0] ss:$8 sps:$4 sm:$0xff]  }
 0x13d   :  { %2945 = vmatpush1.bf16.msra.mxu0 %v3871_v16  ;;  %2563 = vmatprep.subr.bf16.mxu1 %v3872_v38  ;;  %v3957_v16 = vld [vmem:[#allocation7 + $0xac0] ss:$8 sps:$4 sm:$0xff]   ;;  %v3958_v38 = vld [vmem:[#allocation7 + $0x4d4] ss:$8 sps:$4 sm:$0xff]  }
 0x13e   :  { %2947 = vmatprep.subr.bf16.mxu0 %v3875_v39  ;;  %v3961_v39 = vld [vmem:[#allocation7 + $0xad4] ss:$8 sps:$4 sm:$0xff]  }
 0x140   :  { %2565 = vmatpush1.bf16.msra.mxu1 %v3874_v40  ;;  %v3960_v40 = vld [vmem:[#allocation7 + $0x4d0] ss:$8 sps:$4 sm:$0xff]  }
 0x141   :  { %2949 = vmatpush1.bf16.msra.mxu0 %v3877_v41  ;;  %2567 = vmatprep.subr.bf16.mxu1 %v3879_v42  ;;  %v3963_v41 = vld [vmem:[#allocation7 + $0xad0] ss:$8 sps:$4 sm:$0xff]   ;;  %v3964_v42 = vld [vmem:[#allocation7 + $0x4e4] ss:$8 sps:$4 sm:$0xff]  }
 0x142   :  { %2951 = vmatprep.subr.bf16.mxu0 %v3883_v44  ;;  %v3967_v44 = vld [vmem:[#allocation7 + $0xae4] ss:$8 sps:$4 sm:$0xff]  }
 0x143   :  { %1634 = vmatmul.mubr.f32.vlgmr.msra.gmra.mrb[0].mxu1 %v4305_v17  ;;  %v3901_v17 = vld [vmem:[#allocation7 + $0xa34] ss:$8 sps:$4 sm:$0xff]  }
 0x144   :  { %2060 = vmatmul.mubr.f32.vlgmr.msra.gmra.mrb[0].mxu0 %v4308_v37  ;;  %2569 = vmatpush1.bf16.msra.mxu1 %v3881_v47  ;;  %v3900_v37 = vld [vmem:[#allocation7 + $0x430] ss:$8 sps:$4 sm:$0xff]   ;;  %v3966_v47 = vld [vmem:[#allocation7 + $0x4e0] ss:$8 sps:$4 sm:$0xff]  }
 0x145   :  { %2953 = vmatpush1.bf16.msra.mxu0 %v3885_v48  ;;  %2571 = vmatprep.subr.bf16.mxu1 %v3886_v50  ;;  %v3969_v48 = vld [vmem:[#allocation7 + $0xae0] ss:$8 sps:$4 sm:$0xff]   ;;  %v3970_v50 = vld [vmem:[#allocation7 + $0x4f4] ss:$8 sps:$4 sm:$0xff]  }
 0x146   :  { %2955 = vmatprep.subr.bf16.mxu0 %v3889_v29  ;;  %1704 = vmatprep.mubr.f32.mxu1 %v1279_v51  ;;  %v3973_v29 = vld [vmem:[#allocation7 + $0xaf4] ss:$8 sps:$4 sm:$0xff]   ;;  %v1264_v51 = vcombine.high %v4316_v27, %v4316_v27  ;;  %v3978_v27 = vld [vmem:[#allocation7 + $0x500] ss:$8 sps:$4 sm:$0xff]  }
 0x147   :  { %2130 = vmatprep.mubr.f32.mxu0 %v1330_v34  ;;  %v1315_v34 = vcombine.high %v4318_v30, %v4318_v30  ;;  %v3982_v30 = vld [vmem:[#allocation7 + $0x514] ss:$8 sps:$4 sm:$0xff]  }
 0x148   :  { %2573 = vmatpush1.bf16.msra.mxu1 %v3888_v52  ;;  %v3972_v52 = vld [vmem:[#allocation7 + $0x4f0] ss:$8 sps:$4 sm:$0xff]  }
 0x149   :  { %2957 = vmatpush1.bf16.msra.mxu0 %v3891_v53  ;;  %2575 = vmatprep.subr.bf16.mxu1 %v3892_v54  ;;  %v3975_v53 = vld [vmem:[#allocation7 + $0xaf0] ss:$8 sps:$4 sm:$0xff]   ;;  %v3976_v54 = vld [vmem:[#allocation7 + $0x504] ss:$8 sps:$4 sm:$0xff]  }
 0x14a   :  { %2959 = vmatprep.subr.bf16.mxu0 %v3895_v55  ;;  %v3979_v55 = vld [vmem:[#allocation7 + $0xb04] ss:$8 sps:$4 sm:$0xff]  }
 0x14c   :  { %2577 = vmatpush1.bf16.msra.mxu1 %v3894_v56  ;;  %v4339_v56 = vrot.slane %v1264_v51, %v4268_v49  ;;  %v4059_v51 = vld [vmem:[#allocation7 + $0xbd0] ss:$8 sps:$4 sm:$0xff]  }
 0x14d   :  { %2961 = vmatpush1.bf16.msra.mxu0 %v3897_v57  ;;  %2579 = vmatprep.subr.bf16.mxu1 %v3898_v58  ;;  %v4342_v57 = vrot.slane %v1315_v34, %v4268_v49  ;;  %v3981_v58 = vld [vmem:[#allocation7 + $0xb00] ss:$8 sps:$4 sm:$0xff]   ;;  %v3984_v49 = vld [vmem:[#allocation7 + $0x510] ss:$8 sps:$4 sm:$0xff]   ;;  %v4060_v34 = vld [vmem:[#allocation7 + $0x5e4] ss:$8 sps:$4 sm:$0xff]  }
 0x14e   :  { %2963 = vmatprep.subr.bf16.mxu0 %v3901_v17  ;;  %v3985_v17 = vld [vmem:[#allocation7 + $0xb14] ss:$8 sps:$4 sm:$0xff]  }
 0x150   :  { %2581 = vmatpush1.bf16.msra.mxu1 %v3900_v37  ;;  %v1280_v37 = vcombine.high %v4339_v56, %v4339_v56 }
 0x151   :  { %2965 = vmatpush1.bf16.msra.mxu0 %v3903_v59  ;;  %2583 = vmatprep.subr.bf16.mxu1 %v3904_v60  ;;  %v1331_v59 = vcombine.high %v4342_v57, %v4342_v57  ;;  %v3987_v60 = vld [vmem:[#allocation7 + $0xb10] ss:$8 sps:$4 sm:$0xff]  }
 0x152   :  { %2967 = vmatprep.subr.bf16.mxu0 %v3907_v61  ;;  %v3988_v61 = vld [vmem:[#allocation7 + $0x524] ss:$8 sps:$4 sm:$0xff]  }
 0x154   :  { %2585 = vmatpush1.bf16.msra.mxu1 %v3906_v62  ;;  %v3991_v62 = vld [vmem:[#allocation7 + $0xb24] ss:$8 sps:$4 sm:$0xff]  }
 0x155   :  { %2969 = vmatpush1.bf16.msra.mxu0 %v3909_v63  ;;  %2587 = vmatprep.subr.bf16.mxu1 %v3910_v0  ;;  %v3990_v63 = vld [vmem:[#allocation7 + $0x520] ss:$8 sps:$4 sm:$0xff]  }
 0x156   :  { %2971 = vmatprep.subr.bf16.mxu0 %v3913_v1  ;;  %v3993_v0 = vld [vmem:[#allocation7 + $0xb20] ss:$8 sps:$4 sm:$0xff]   ;;  %v3994_v1 = vld [vmem:[#allocation7 + $0x534] ss:$8 sps:$4 sm:$0xff]  }
 0x158   :  { %2589 = vmatpush1.bf16.msra.mxu1 %v3912_v2  ;;  %v3999_v2 = vld [vmem:[#allocation7 + $0xb30] ss:$8 sps:$4 sm:$0xff]  }
 0x159   :  { %2973 = vmatpush1.bf16.msra.mxu0 %v3915_v3  ;;  %2591 = vmatprep.subr.bf16.mxu1 %v3916_v4  ;;  %v4000_v3 = vld [vmem:[#allocation7 + $0x544] ss:$8 sps:$4 sm:$0xff]  }
 0x15a   :  { %2975 = vmatprep.subr.bf16.mxu0 %v3919_v5  ;;  %v4003_v4 = vld [vmem:[#allocation7 + $0xb44] ss:$8 sps:$4 sm:$0xff]   ;;  %v4002_v5 = vld [vmem:[#allocation7 + $0x540] ss:$8 sps:$4 sm:$0xff]  }
 0x15c   :  { %2593 = vmatpush1.bf16.msra.mxu1 %v3918_v6  ;;  %v4005_v6 = vld [vmem:[#allocation7 + $0xb40] ss:$8 sps:$4 sm:$0xff]  }
 0x15d   :  { %2977 = vmatpush1.bf16.msra.mxu0 %v3921_v7  ;;  %2595 = vmatprep.subr.bf16.mxu1 %v3922_v8  ;;  %v4006_v7 = vld [vmem:[#allocation7 + $0x554] ss:$8 sps:$4 sm:$0xff]  }
 0x15e   :  { %2979 = vmatprep.subr.bf16.mxu0 %v3925_v9  ;;  %v4009_v8 = vld [vmem:[#allocation7 + $0xb54] ss:$8 sps:$4 sm:$0xff]   ;;  %v4008_v9 = vld [vmem:[#allocation7 + $0x550] ss:$8 sps:$4 sm:$0xff]  }
 0x160   :  { %2597 = vmatpush1.bf16.msra.mxu1 %v3924_v10  ;;  %v4011_v10 = vld [vmem:[#allocation7 + $0xb50] ss:$8 sps:$4 sm:$0xff]  }
 0x161   :  { %2981 = vmatpush1.bf16.msra.mxu0 %v3927_v11  ;;  %2599 = vmatprep.subr.bf16.mxu1 %v3928_v12  ;;  %v4012_v11 = vld [vmem:[#allocation7 + $0x564] ss:$8 sps:$4 sm:$0xff]  }
 0x162   :  { %2983 = vmatprep.subr.bf16.mxu0 %v3931_v13  ;;  %v4015_v12 = vld [vmem:[#allocation7 + $0xb64] ss:$8 sps:$4 sm:$0xff]   ;;  %v4014_v13 = vld [vmem:[#allocation7 + $0x560] ss:$8 sps:$4 sm:$0xff]  }
 0x164   :  { %2601 = vmatpush1.bf16.msra.mxu1 %v3930_v14  ;;  %v4017_v14 = vld [vmem:[#allocation7 + $0xb60] ss:$8 sps:$4 sm:$0xff]  }
 0x165   :  { %2985 = vmatpush1.bf16.msra.mxu0 %v3933_v15  ;;  %2603 = vmatprep.subr.bf16.mxu1 %v3934_v18  ;;  %v4018_v15 = vld [vmem:[#allocation7 + $0x574] ss:$8 sps:$4 sm:$0xff]  }
 0x166   :  { %2987 = vmatprep.subr.bf16.mxu0 %v3937_v19  ;;  %v4021_v18 = vld [vmem:[#allocation7 + $0xb74] ss:$8 sps:$4 sm:$0xff]   ;;  %v4020_v19 = vld [vmem:[#allocation7 + $0x570] ss:$8 sps:$4 sm:$0xff]  }
 0x168   :  { %2605 = vmatpush1.bf16.msra.mxu1 %v3936_v20  ;;  %v4023_v20 = vld [vmem:[#allocation7 + $0xb70] ss:$8 sps:$4 sm:$0xff]  }
 0x169   :  { %2989 = vmatpush1.bf16.msra.mxu0 %v3939_v21  ;;  %2607 = vmatprep.subr.bf16.mxu1 %v3940_v22  ;;  %v4024_v21 = vld [vmem:[#allocation7 + $0x584] ss:$8 sps:$4 sm:$0xff]  }
 0x16a   :  { %2991 = vmatprep.subr.bf16.mxu0 %v3943_v23  ;;  %v4027_v22 = vld [vmem:[#allocation7 + $0xb84] ss:$8 sps:$4 sm:$0xff]   ;;  %v4026_v23 = vld [vmem:[#allocation7 + $0x580] ss:$8 sps:$4 sm:$0xff]  }
 0x16c   :  { %2609 = vmatpush1.bf16.msra.mxu1 %v3942_v24  ;;  %v4029_v24 = vld [vmem:[#allocation7 + $0xb80] ss:$8 sps:$4 sm:$0xff]  }
 0x16d   :  { %2993 = vmatpush1.bf16.msra.mxu0 %v3945_v25  ;;  %2611 = vmatprep.subr.bf16.mxu1 %v3946_v26  ;;  %v4030_v25 = vld [vmem:[#allocation7 + $0x594] ss:$8 sps:$4 sm:$0xff]  }
 0x16e   :  { %2995 = vmatprep.subr.bf16.mxu0 %v3949_v28  ;;  %v4033_v26 = vld [vmem:[#allocation7 + $0xb94] ss:$8 sps:$4 sm:$0xff]   ;;  %v4032_v28 = vld [vmem:[#allocation7 + $0x590] ss:$8 sps:$4 sm:$0xff]  }
 0x170   :  { %2613 = vmatpush1.bf16.msra.mxu1 %v3948_v31  ;;  %v4035_v31 = vld [vmem:[#allocation7 + $0xb90] ss:$8 sps:$4 sm:$0xff]  }
 0x171   :  { %2997 = vmatpush1.bf16.msra.mxu0 %v3951_v32  ;;  %2615 = vmatprep.subr.bf16.mxu1 %v3952_v33  ;;  %v4036_v32 = vld [vmem:[#allocation7 + $0x5a4] ss:$8 sps:$4 sm:$0xff]  }
 0x172   :  { %2999 = vmatprep.subr.bf16.mxu0 %v3955_v35  ;;  %v4039_v33 = vld [vmem:[#allocation7 + $0xba4] ss:$8 sps:$4 sm:$0xff]   ;;  %v4038_v35 = vld [vmem:[#allocation7 + $0x5a0] ss:$8 sps:$4 sm:$0xff]  }
 0x174   :  { %2617 = vmatpush1.bf16.msra.mxu1 %v3954_v36  ;;  %v4041_v36 = vld [vmem:[#allocation7 + $0xba0] ss:$8 sps:$4 sm:$0xff]  }
 0x175   :  { %3001 = vmatpush1.bf16.msra.mxu0 %v3957_v16  ;;  %2619 = vmatprep.subr.bf16.mxu1 %v3958_v38  ;;  %v4042_v16 = vld [vmem:[#allocation7 + $0x5b4] ss:$8 sps:$4 sm:$0xff]  }
 0x176   :  { %3003 = vmatprep.subr.bf16.mxu0 %v3961_v39  ;;  %v4045_v38 = vld [vmem:[#allocation7 + $0xbb4] ss:$8 sps:$4 sm:$0xff]   ;;  %v4044_v39 = vld [vmem:[#allocation7 + $0x5b0] ss:$8 sps:$4 sm:$0xff]  }
 0x178   :  { %2621 = vmatpush1.bf16.msra.mxu1 %v3960_v40  ;;  %v4047_v40 = vld [vmem:[#allocation7 + $0xbb0] ss:$8 sps:$4 sm:$0xff]  }
 0x179   :  { %3005 = vmatpush1.bf16.msra.mxu0 %v3963_v41  ;;  %2623 = vmatprep.subr.bf16.mxu1 %v3964_v42  ;;  %v4048_v41 = vld [vmem:[#allocation7 + $0x5c4] ss:$8 sps:$4 sm:$0xff]  }
 0x17a   :  { %3007 = vmatprep.subr.bf16.mxu0 %v3967_v44  ;;  %v4051_v42 = vld [vmem:[#allocation7 + $0xbc4] ss:$8 sps:$4 sm:$0xff]   ;;  %v4050_v44 = vld [vmem:[#allocation7 + $0x5c0] ss:$8 sps:$4 sm:$0xff]  }
 0x17c   :  { %2625 = vmatpush1.bf16.msra.mxu1 %v3966_v47  ;;  %v4053_v47 = vld [vmem:[#allocation7 + $0xbc0] ss:$8 sps:$4 sm:$0xff]  }
 0x17d   :  { %3009 = vmatpush1.bf16.msra.mxu0 %v3969_v48  ;;  %2627 = vmatprep.subr.bf16.mxu1 %v3970_v50  ;;  %v4054_v48 = vld [vmem:[#allocation7 + $0x5d4] ss:$8 sps:$4 sm:$0xff]  }
 0x17e   :  { %3011 = vmatprep.subr.bf16.mxu0 %v3973_v29  ;;  %v4057_v50 = vld [vmem:[#allocation7 + $0xbd4] ss:$8 sps:$4 sm:$0xff]   ;;  %v4056_v29 = vld [vmem:[#allocation7 + $0x5d0] ss:$8 sps:$4 sm:$0xff]  }
 0x180   :  { %2629 = vmatpush1.bf16.msra.mxu1 %v3972_v52  ;;  %v4063_v52 = vld [vmem:[#allocation7 + $0xbe4] ss:$8 sps:$4 sm:$0xff]  }
 0x181   :  { %3013 = vmatpush1.bf16.msra.mxu0 %v3975_v53  ;;  %2631 = vmatprep.subr.bf16.mxu1 %v3976_v54  ;;  %v4062_v53 = vld [vmem:[#allocation7 + $0x5e0] ss:$8 sps:$4 sm:$0xff]  }
 0x182   :  { %3015 = vmatprep.subr.bf16.mxu0 %v3979_v55  ;;  %v4065_v54 = vld [vmem:[#allocation7 + $0xbe0] ss:$8 sps:$4 sm:$0xff]   ;;  %v4066_v55 = vld [vmem:[#allocation7 + $0x5f4] ss:$8 sps:$4 sm:$0xff]  }
 0x183   :  { %1705 = vmatmul.mubr.f32.vlgmr.msra.gmra.mrb[0].mxu1 %v4322_v45  ;;  %v3997_v45 = vld [vmem:[#allocation7 + $0xb34] ss:$8 sps:$4 sm:$0xff]  }
 0x184   :  { %2131 = vmatmul.mubr.f32.vlgmr.msra.gmra.mrb[0].mxu0 %v4326_v46  ;;  %2633 = vmatpush1.bf16.msra.mxu1 %v3978_v27  ;;  %v3996_v46 = vld [vmem:[#allocation7 + $0x530] ss:$8 sps:$4 sm:$0xff]   ;;  %v4069_v27 = vld [vmem:[#allocation7 + $0xbf4] ss:$8 sps:$4 sm:$0xff]  }
 0x185   :  { %3017 = vmatpush1.bf16.msra.mxu0 %v3981_v58  ;;  %2635 = vmatprep.subr.bf16.mxu1 %v3982_v30  ;;  %v4068_v58 = vld [vmem:[#allocation7 + $0x5f0] ss:$8 sps:$4 sm:$0xff]  }
 0x186   :  { %3019 = vmatprep.subr.bf16.mxu0 %v3985_v17  ;;  %1775 = vmatprep.mubr.f32.mxu1 %v1280_v37  ;;  %v4071_v30 = vld [vmem:[#allocation7 + $0xbf0] ss:$8 sps:$4 sm:$0xff]  }
 0x187   :  { %2201 = vmatprep.mubr.f32.mxu0 %v1331_v59 }
 0x188   :  { %2637 = vmatpush1.bf16.msra.mxu1 %v3984_v49 }
 0x189   :  { %3021 = vmatpush1.bf16.msra.mxu0 %v3987_v60  ;;  %2639 = vmatprep.subr.bf16.mxu1 %v3988_v61 }
 0x18a   :  { %3023 = vmatprep.subr.bf16.mxu0 %v3991_v62 }
 0x18c   :  { %2641 = vmatpush1.bf16.msra.mxu1 %v3990_v63 }
 0x18d   :  { %3025 = vmatpush1.bf16.msra.mxu0 %v3993_v0  ;;  %2643 = vmatprep.subr.bf16.mxu1 %v3994_v1 }
 0x18e   :  { %3027 = vmatprep.subr.bf16.mxu0 %v3997_v45 }
 0x190   :  { %2645 = vmatpush1.bf16.msra.mxu1 %v3996_v46 }
 0x191   :  { %3029 = vmatpush1.bf16.msra.mxu0 %v3999_v2  ;;  %2647 = vmatprep.subr.bf16.mxu1 %v4000_v3  ;;  %v2220_v3 = vld [vmem:[#allocation9] sm:$0x3] }
 0x192   :  { %3031 = vmatprep.subr.bf16.mxu0 %v4003_v4 }
 0x194   :  { %2649 = vmatpush1.bf16.msra.mxu1 %v4002_v5 }
 0x195   :  { %3033 = vmatpush1.bf16.msra.mxu0 %v4005_v6  ;;  %2651 = vmatprep.subr.bf16.mxu1 %v4006_v7 }
 0x196   :  { %3035 = vmatprep.subr.bf16.mxu0 %v4009_v8 }
 0x198   :  { %2653 = vmatpush1.bf16.msra.mxu1 %v4008_v9 }
 0x199   :  { %3037 = vmatpush1.bf16.msra.mxu0 %v4011_v10  ;;  %2655 = vmatprep.subr.bf16.mxu1 %v4012_v11 }
 0x19a   :  { %3039 = vmatprep.subr.bf16.mxu0 %v4015_v12 }
 0x19c   :  { %2657 = vmatpush1.bf16.msra.mxu1 %v4014_v13 }
 0x19d   :  { %3041 = vmatpush1.bf16.msra.mxu0 %v4017_v14  ;;  %2659 = vmatprep.subr.bf16.mxu1 %v4018_v15  ;;  %v2256_v15 = vstv %s2306_s12 }
 0x19e   :  { %3043 = vmatprep.subr.bf16.mxu0 %v4021_v18  ;;  %v2267_v18 = vstv %s2307_s2 }
 0x1a0   :  { %2661 = vmatpush1.bf16.msra.mxu1 %v4020_v19 }
 0x1a1   :  { %3045 = vmatpush1.bf16.msra.mxu0 %v4023_v20  ;;  %2663 = vmatprep.subr.bf16.mxu1 %v4024_v21  ;;  %v2257_v20 = vmin.f32 %v2256_v15, 0.4  ;;  %v2268_v21 = vmin.f32 %v2267_v18, 0.4 }
 0x1a2   :  { %3047 = vmatprep.subr.bf16.mxu0 %v4027_v22  ;;  %v2261_v22 = vstv %s2260_s13 }
 0x1a3   :  { %vm2262_vm1 = vcmp.eq.s32.totalorder %v2261_v22, 1 }
 0x1a4   :  { %2665 = vmatpush1.bf16.msra.mxu1 %v4026_v23 }
 0x1a5   :  { %3049 = vmatpush1.bf16.msra.mxu0 %v4029_v24  ;;  %2667 = vmatprep.subr.bf16.mxu1 %v4030_v25  ;;  %v2259_v24 = vmin.f32 %v2256_v15, 0.88  ;;  %v2258_v25 = vmin.f32 %v2257_v20, 0.88 }
 0x1a6   :  { %3051 = vmatprep.subr.bf16.mxu0 %v4033_v26  ;;  %v2269_v26 = vmin.f32 %v2268_v21, 0.88 }
 0x1a8   :  { %2669 = vmatpush1.bf16.msra.mxu1 %v4032_v28  ;;  %v2270_v28 = vmin.f32 %v2267_v18, 0.88 }
 0x1a9   :  { %3053 = vmatpush1.bf16.msra.mxu0 %v4035_v31  ;;  %2671 = vmatprep.subr.bf16.mxu1 %v4036_v32  ;;  %v2277_v31 = vstv %s2308_s14 }
 0x1aa   :  { %3055 = vmatprep.subr.bf16.mxu0 %v4039_v33  ;;  %v2263_v33 = vsel %vm2262_vm1, %v2258_v25, %v2259_v24 }
 0x1ac   :  { %2673 = vmatpush1.bf16.msra.mxu1 %v4038_v35  ;;  %v2271_v35 = vsel %vm2262_vm1, %v2269_v26, %v2270_v28 }
 0x1ad   :  { %3057 = vmatpush1.bf16.msra.mxu0 %v4041_v36  ;;  %2675 = vmatprep.subr.bf16.mxu1 %v4042_v16  ;;  %v2278_v36 = vmin.f32 %v2277_v31, 0.5  ;;  %v2281_v16 = vstv %s2309_s15 }
 0x1ae   :  { %3059 = vmatprep.subr.bf16.mxu0 %v4045_v38 }
 0x1b0   :  { %2677 = vmatpush1.bf16.msra.mxu1 %v4044_v39 }
 0x1b1   :  { %3061 = vmatpush1.bf16.msra.mxu0 %v4047_v40  ;;  %2679 = vmatprep.subr.bf16.mxu1 %v4048_v41  ;;  %v2279_v40 = vsub.f32 0.0, %v2278_v36  ;;  %v2282_v41 = vmin.f32 %v2281_v16, 0.5 }
 0x1b2   :  { %3063 = vmatprep.subr.bf16.mxu0 %v4051_v42 }
 0x1b4   :  { %2681 = vmatpush1.bf16.msra.mxu1 %v4050_v44 }
 0x1b5   :  { %3065 = vmatpush1.bf16.msra.mxu0 %v4053_v47  ;;  %2683 = vmatprep.subr.bf16.mxu1 %v4054_v48 }
 0x1b6   :  { %3067 = vmatprep.subr.bf16.mxu0 %v4057_v50  ;;  %v2283_v50 = vsub.f32 %v2279_v40, %v2282_v41 }
 0x1b8   :  { %2685 = vmatpush1.bf16.msra.mxu1 %v4056_v29 }
 0x1b9   :  { %3069 = vmatpush1.bf16.msra.mxu0 %v4059_v51  ;;  %2687 = vmatprep.subr.bf16.mxu1 %v4060_v34 }
 0x1ba   :  { %3071 = vmatprep.subr.bf16.mxu0 %v4063_v52  ;;  %v2284_v52 = vmul.f32 6.0, %v2283_v50 }
 0x1bc   :  { %2689 = vmatpush1.bf16.msra.mxu1 %v4062_v53 }
 0x1bd   :  { %3073 = vmatpush1.bf16.msra.mxu0 %v4065_v54  ;;  %2691 = vmatprep.subr.bf16.mxu1 %v4066_v55 }
 0x1be   :  { %3075 = vmatprep.subr.bf16.mxu0 %v4069_v27 }
 0x1c0   :  { %2693 = vmatpush1.bf16.msra.mxu1 %v4068_v58 }
 0x1c1   :  { %3077 = vmatpush1.bf16.msra.mxu0 %v4071_v30 }
 0x1c3   :  { %1776 = vmatmul.mubr.f32.vlgmr.msra.gmra.mrb[0].mxu1 %v4339_v56  ;;  %v2224_v56 = vsub.s32 0, %v4265_v43 }
 0x1c4   :  { %2202 = vmatmul.mubr.f32.vlgmr.msra.gmra.mrb[0].mxu0 %v4342_v57  ;;  %v2228_v57 = vsub.s32 1, %v4265_v43  ;;  %v2250_v43 = vstv %s2249_s11 }
 0x1c5   :  { %v2225_v4 = vrot.slane %v2220_v3, %v2224_v56  ;;  %v2251_v14 = vmul.f32 1.442695, %v2250_v43 }
 0x1c6   :  { %v2229_v5 = vrot.slane %v2220_v3, %v2228_v57 }
 0x296   :  { %v1777_v17 = vpop.f32.mrb[0].mxu1 }
 0x297   :  { %v2203_v37 = vpop.f32.mrb[0].mxu0  ;;  %v1779_v49 = vpop.f32.mrb[1].mxu1 }
 0x298   :  { %v3078_v59 = vadd.f32 %v2203_v37, %v1777_v17  ;;  %v2205_v60 = vpop.f32.mrb[1].mxu0 }
 0x299   :  { %v3079_v61 = vadd.f32 %v2205_v60, %v1779_v49 }
 0x29a   :  { %v2208_v62 = vmul.f32 %v3078_v59, %v3078_v59 }
 0x29b   :  { %v2209_v63 = vmul.f32 %v3079_v61, %v3079_v61 }
 0x29c   :  { %v2211_v0 = vsel %vm2210_vm0, %v2208_v62, 0.0 }
 0x29d   :  { %v2212_v1 = vsel %vm2210_vm0, %v2209_v63, 0.0 }
 0x29e   :  { %v2213_v45 = vadd.f32 %v2212_v1, %v2211_v0 }
 0x2a0   :  { %2214 = vadd.xlane.f32.xlu0 %v2213_v45 }
 0x32d   :  { %v2215_v46 = vpop.xlane.xlu0 %2214 }
 0x32e   :  { %v2216_v2 = vadd.f32 1e-12, %v2215_v46 }
 0x330   :  { %4074 = vrsqrt.f32 %v2216_v2 }
 0x331   :  { %4076 = vpow2.f32 %v2251_v14 }
 0x33a   :  { %v4075_v6 = vpop.eup %4074 }
 0x33b   :  { %v2218_v7 = vmul.f32 %v4075_v6, %v3078_v59  ;;  %v2219_v8 = vmul.f32 %v4075_v6, %v3079_v61  ;;  %v4077_v19 = vpop.eup %4076 }
 0x33c   :  { %v2253_v23 = vsub.f32 1.0, %v4077_v19 }
 0x33d   :  { %v2232_v9 = vmul.f32 %v2225_v4, %v2218_v7  ;;  %v2233_v10 = vmul.f32 %v2229_v5, %v2219_v8 }
 0x33e   :  { %v2264_v32 = vsub.f32 0.0, %v2253_v23 }
 0x33f   :  { %v2234_v11 = vsel %vm2210_vm0, %v2232_v9, 0.0  ;;  %v2235_v12 = vsel %vm2210_vm0, %v2233_v10, 0.0 }
 0x340   :  { %v2236_v13 = vadd.f32 %v2235_v12, %v2234_v11  ;;  %v2265_v38 = vmul.f32 %v2264_v32, %v2263_v33  ;;  %v2272_v39 = vmul.f32 %v2271_v35, %v2264_v32 }
 0x342   :  { %2237 = vadd.xlane.f32.xlu0 %v2236_v13  ;;  %v2273_v44 = vadd.f32 %v2272_v39, %v2265_v38 }
 0x344   :  { %v2274_v29 = vmul.f32 0.25, %v2273_v44 }
 0x3cf   :  { %v2238_v42 = vpop.xlane.xlu0 %2237 }
 0x3d0   :  { %v2239_v47 = vsub.f32 1.0, %v2238_v42 }
 0x3d2   :  { %v2241_v48 = vrot.slane %v2239_v47, 1 }
 0x3d4   :  { %v2243_v51 = vadd.f32 %v2241_v48, %v2239_v47 }
 0x3d6   :  { %v2244_v34 = vmul.f32 0.5, %v2243_v51 }
 0x3d8   :  { %v2275_v53 = vadd.f32 %v2274_v29, %v2244_v34 }
 0x3da   :  { %v2285_v54 = vadd.f32 %v2284_v52, %v2275_v53 }
 0x3dc   :  { %2287 = vst.msk [vmem:[#allocation10] sm:$0x1] %vm2286_vm2, %v2285_v54 }
 0x3dd   :  { %4165 = shalt.err (!%p4162_p4)
}
 0x3de   :  { %s4166_s22 = scalar_lea.hbm %s4374_s4, 16 }
 0x3df   :  { %p4167_p5 = scmp.ne.s32.totalorder %s4374_s4, %s4166_s22  ;;  %p4170_p6 = scmp.lt.u32.totalorder %s4166_s22, %s4374_s4 }
 0x3e1   :  { %p4172_p7 = pnand %p4170_p6, %p4167_p5 }
 0x3e3   :  { %4175 = shalt.err (!%p4172_p7)
}
 0x3e4   :  { %2297 = dma.vmem_to_hbm [thread:$0]  %s2295_s17, 16, %s4374_s4, [#allocation4]  }
 0x3e5   :  { %4182 = dma.done.wait [#allocation4], 16  }
 0x3e6   :  { %4183 = vsyncadd [#allocation4], 4294967280 }
 0x3e7   :  { %2301 = vsyncpa [#allocation3], 1 }
 0x3e8   :  { %2302 = vsyncpa [#allocation8], 1 }
 0x3e9   :  { %2303 = vsyncpa [#allocation4], 1 }
 0x3ea   :  { %2304 = vsyncpa [#allocation5], 1 }

</bundles_post_ra>
